<compile_context>
chip_gen: v7x
topology: tpu7x:2x2x1
jax: 0.10.0
libtpu: 0.0.40
codegen_flags: <defaults>
</compile_context>

<pallas_src>
import functools
import math

import jax
import jax.numpy as jnp
from jax.experimental import pallas as pl
from jax.experimental.pallas import tpu as pltpu


def _tpu_vmem_capacity_bytes():
    try:
        return int(pltpu.get_tpu_info().vmem_capacity_bytes)
    except Exception:
        return 64 << 20                       # conservative (v7x-sized) fallback


_VMEM_CAPACITY = _tpu_vmem_capacity_bytes()
_VMEM_LIMIT_CAP = max(_VMEM_CAPACITY - (12 << 20), 32 << 20)
# Fused path is a gridless single program (one TensorCore on v7x); keep it for
# small configs only so bigger configs use the layered kernel, whose parallel
# N axis shards across both TCs.
_FUSED_PARAM_BUDGET = min(_VMEM_CAPACITY // 4, 24 << 20)


def _vmem_limit(needed_bytes):
    return int(min(max(needed_bytes + (8 << 20), 32 << 20), _VMEM_LIMIT_CAP))


def _round_up(n, m):
    return ((n + m - 1) // m) * m


def _pad_dim(d):
    # Lane-dense (multiple-of-128) feature dims; large dims rounded to 512 so
    # big weight tiles divide them (20000->20480, 10000->10240, 5000->5120,
    # 80->128).
    return _round_up(d, 128) if d < 2048 else _round_up(d, 512)


def _pick_tile(dim, candidates, prefer_multiple_blocks=False):
    for c in candidates:
        if dim % c == 0 and (not prefer_multiple_blocks or dim // c >= 2):
            return c
    for c in candidates:
        if dim % c == 0:
            return c
    return dim


# ----------------------------------------------------------------------------
# Fused kernel: whole forward (enc(x), dec(m), enc(dec(m)), dec(enc(x))) in one
# pallas_call. All (bf16) weights and (f32) biases are VMEM-resident;
# activations never touch HBM.
# ----------------------------------------------------------------------------
def _fused_forward_kernel(
    x_ref, m_ref,
    we0_ref, be0_ref, we1_ref, be1_ref, we2_ref, be2_ref,
    wd0_ref, bd0_ref, wd1_ref, bd1_ref, wd2_ref, bd2_ref,
    enc_ref, dec_ref, enc2_ref, dec2_ref,
):
    def layer(h, w_ref, b_ref):
        y = jnp.dot(h.astype(w_ref.dtype), w_ref[...],
                    preferred_element_type=jnp.float32)
        return jnp.maximum(y + b_ref[...], 0.0)

    def encoder(h):
        h = layer(h, we0_ref, be0_ref)
        h = layer(h, we1_ref, be1_ref)
        return layer(h, we2_ref, be2_ref)

    def decoder(h):
        h = layer(h, wd0_ref, bd0_ref)
        h = layer(h, wd1_ref, bd1_ref)
        return layer(h, wd2_ref, bd2_ref)

    x = x_ref[...].astype(jnp.float32)
    m = m_ref[...].astype(jnp.float32)

    enc_o = encoder(x)      # encoder(flatten(permittivity))
    dec_o = decoder(m)      # decoder(measurement) — independent of enc_o
    enc_ref[...] = enc_o.astype(enc_ref.dtype)
    dec_ref[...] = dec_o.astype(dec_ref.dtype)
    enc2_ref[...] = encoder(dec_o).astype(enc2_ref.dtype)
    dec2_ref[...] = decoder(enc_o).astype(dec2_ref.dtype)


def _fused_forward(params, measurement, x):
    B, mesh_p = x.shape
    nm_p = measurement.shape[1]

    flat = []
    for name in ("enc0", "enc1", "enc2", "dec0", "dec1", "dec2"):
        wt, b = params[name]
        flat += [wt, b]

    out_shape = (
        jax.ShapeDtypeStruct((B, nm_p), jnp.float32),    # encoder_output
        jax.ShapeDtypeStruct((B, mesh_p), jnp.float32),  # decoder_output
        jax.ShapeDtypeStruct((B, nm_p), jnp.float32),    # encoder_output_2
        jax.ShapeDtypeStruct((B, mesh_p), jnp.float32),  # decoder_output_2
    )

    operands = [x, measurement] + flat
    needed = sum(int(a.size) * a.dtype.itemsize for a in operands)
    needed += sum(math.prod(s.shape) * 4 for s in out_shape)

    vmem = pl.BlockSpec(memory_space=pltpu.MemorySpace.VMEM)
    return pl.pallas_call(
        _fused_forward_kernel,
        out_shape=out_shape,
        in_specs=[vmem] * len(operands),
        out_specs=(vmem, vmem, vmem, vmem),
        compiler_params=pltpu.CompilerParams(
            vmem_limit_bytes=_vmem_limit(needed),
        ),
    )(*operands)


# ----------------------------------------------------------------------------
# Tiled per-layer kernel for large layers: out = relu(x @ Wt + b)
#   x  : (Bp, K) f32  — full-K, VMEM-resident across the whole grid
#   Wt : (K, N)  bf16 — pre-transposed, tiled (tk, tn)
#   b  : (1, N)  f32  — tiled (1, tn)
#   out: (Bp, N) f32  — accumulated in-place across the K ("arbitrary") axis
# ----------------------------------------------------------------------------
def _linear_relu_kernel(x_ref, w_ref, b_ref, o_ref):
    k = pl.program_id(1)
    tk = w_ref.shape[0]

    @pl.when(k == 0)
    def _():
        o_ref[...] = jnp.zeros_like(o_ref)

    x_blk = x_ref[:, pl.ds(pl.multiple_of(k * tk, tk), tk)]
    o_ref[...] += jnp.dot(x_blk.astype(w_ref.dtype), w_ref[...],
                          preferred_element_type=jnp.float32)

    @pl.when(k == pl.num_programs(1) - 1)
    def _():
        o_ref[...] = jnp.maximum(o_ref[...] + b_ref[...], 0.0)


def linear_relu(x, wt, b):
    """relu(x @ wt + b); wt pre-transposed to (in, out) bf16, b (1, out) f32."""
    B, K = x.shape
    N = wt.shape[1]
    assert wt.shape[0] == K and b.shape == (1, N)

    # Pad batch to full 8-sublane rows so output stores are unmasked.
    Bp = max(8, _round_up(B, 8))
    if Bp != B:
        x = jnp.pad(x, ((0, Bp - B), (0, 0)))

    # Large (multiple-of-128) tiles chosen from divisors of the padded dims;
    # prefer >= 2 N-blocks so the "parallel" axis can shard across v7x's TCs.
    tn = _pick_tile(N, (2048, 1024, 512, 256, 128), prefer_multiple_blocks=True)
    tk = _pick_tile(K, (2048, 1024, 512, 256, 128))

    needed = (2 * Bp * K * 4                      # resident x (double-buffered)
              + 2 * tk * tn * wt.dtype.itemsize   # weight tile (double-buffered)
              + 2 * tn * 4                        # bias tile
              + 2 * Bp * tn * 4)                  # output block

    out = pl.pallas_call(
        _linear_relu_kernel,
        out_shape=jax.ShapeDtypeStruct((Bp, N), jnp.float32),
        grid_spec=pltpu.PrefetchScalarGridSpec(
            num_scalar_prefetch=0,
            grid=(N // tn, K // tk),
            in_specs=[
                pl.BlockSpec((Bp, K), lambda j, k: (0, 0)),    # x: VMEM-resident
                pl.BlockSpec((tk, tn), lambda j, k: (k, j)),   # weight tile
                pl.BlockSpec((1, tn), lambda j, k: (0, j)),    # bias tile
            ],
            out_specs=pl.BlockSpec((Bp, tn), lambda j, k: (0, j)),
        ),
        compiler_params=pltpu.CompilerParams(
            dimension_semantics=("parallel", "arbitrary"),
            vmem_limit_bytes=_vmem_limit(needed),
        ),
    )(x, wt, b)
    return out[:B] if Bp != B else out


def _encoder_layered(params, h):
    for name in ("enc0", "enc1", "enc2"):
        h = linear_relu(h, *params[name])
    return h


def _decoder_layered(params, h):
    for name in ("dec0", "dec1", "dec2"):
        h = linear_relu(h, *params[name])
    return h


def _layered_forward(params, measurement, x):
    B = x.shape[0]
    # Pass 1: decoder weights streamed once for dec(m).
    dec_o = _decoder_layered(params, measurement)
    # Pass 2: encoder weights streamed ONCE for both enc(x) and enc(dec(m))
    # by batching the two (row-wise independent) inputs.
    enc_both = _encoder_layered(params, jnp.concatenate([x, dec_o], axis=0))
    enc_o, enc_o2 = enc_both[:B], enc_both[B:]
    # Pass 3: decoder weights streamed once more for dec(enc(x)).
    dec_o2 = _decoder_layered(params, enc_o)
    return enc_o, dec_o, enc_o2, dec_o2


# ----------------------------------------------------------------------------
# Parameters + top-level forward (same semantics as FNNAutoencoder.forward).
# ----------------------------------------------------------------------------
def init_params(key, num_measurements, mesh_res, hidden1, hidden2):
    """PyTorch nn.Linear-style init. Weights are transposed to (in, out),
    zero-padded to lane-friendly dims and cast to bf16 ONCE at init."""
    def linear(key, in_f, out_f):
        kw, kb = jax.random.split(key)
        bound = 1.0 / math.sqrt(in_f)
        w = jax.random.uniform(kw, (out_f, in_f), jnp.float32, -bound, bound)
        b = jax.random.uniform(kb, (out_f,), jnp.float32, -bound, bound)
        in_p, out_p = _pad_dim(in_f), _pad_dim(out_f)
        wt = jnp.zeros((in_p, out_p), jnp.bfloat16)
        wt = wt.at[:in_f, :out_f].set(w.T.astype(jnp.bfloat16))
        bp = jnp.zeros((1, out_p), jnp.float32).at[0, :out_f].set(b)
        return wt, bp

    keys = jax.random.split(key, 6)
    return {
        "enc0": linear(keys[0], mesh_res, hidden1),
        "enc1": linear(keys[1], hidden1, hidden2),
        "enc2": linear(keys[2], hidden2, num_measurements),
        "dec0": linear(keys[3], num_measurements, hidden2),
        "dec1": linear(keys[4], hidden2, hidden1),
        "dec2": linear(keys[5], hidden1, mesh_res),
    }


@functools.partial(jax.jit, static_argnames=("force_layered",))
def fnn_autoencoder_forward(params, measurement, permittivity,
                            force_layered=False):
    B = permittivity.shape[0]
    x = permittivity.reshape(B, -1)                 # nn.Flatten()
    mesh_res = x.shape[1]
    num_meas = measurement.shape[1]

    # Padded feature dims are recovered from the (static) parameter shapes.
    mesh_p = params["enc0"][0].shape[0]
    nm_p = params["dec0"][0].shape[0]
    if mesh_p != mesh_res:
        x = jnp.pad(x, ((0, 0), (0, mesh_p - mesh_res)))
    m = measurement
    if nm_p != num_meas:
        m = jnp.pad(m, ((0, 0), (0, nm_p - num_meas)))

    param_bytes = sum(
        int(w.size) * w.dtype.itemsize + int(b.size) * b.dtype.itemsize
        for (w, b) in params.values()
    )
    if param_bytes <= _FUSED_PARAM_BUDGET and not force_layered:
        enc_o, dec_o, enc_o2, dec_o2 = _fused_forward(params, m, x)
    else:
        # Full-size config (~0.5 GB of bf16 weights) cannot be VMEM-resident.
        enc_o, dec_o, enc_o2, dec_o2 = _layered_forward(params, m, x)

    return (enc_o[:, :num_meas], dec_o[:, :mesh_res],
            enc_o2[:, :num_meas], dec_o2[:, :mesh_res])


if __name__ == "__main__":
    # Scaled-down config (original: mesh 100x200, hidden 10000/5000, meas 80).
    B = 2
    mesh_height, mesh_width = 8, 16
    mesh_res = mesh_height * mesh_width            # 128
    num_measurements = 80                          # exercises the 80 -> 128 pad
    hidden1, hidden2 = 256, 128

    key = jax.random.PRNGKey(0)
    kp, km, kx = jax.random.split(key, 3)

    params = init_params(kp, num_measurements, mesh_res, hidden1, hidden2)
    measurement = jax.random.normal(km, (B, num_measurements), jnp.float32)
    permittivity = jax.random.normal(kx, (B, mesh_height, mesh_width), jnp.float32)

    # Fused single-pallas_call path (selected at this size).
    outs = jax.block_until_ready(
        fnn_autoencoder_forward(params, measurement, permittivity))
    # Tiled, 3-weight-pass layered path, forced so it is also exercised.
    outs_layered = jax.block_until_ready(
        fnn_autoencoder_forward(params, measurement, permittivity,
                                force_layered=True))

    for o, n in zip(outs, (num_measurements, mesh_res,
                           num_measurements, mesh_res)):
        assert o.shape == (B, n)

    # Pure-JAX reference of the same forward (same bf16 weights, f32 accum).
    def ref_forward(params, measurement, permittivity):
        Bq = permittivity.shape[0]
        xf = permittivity.reshape(Bq, -1)
        mesh_p = params["enc0"][0].shape[0]
        nm_p = params["dec0"][0].shape[0]
        xp = jnp.pad(xf, ((0, 0), (0, mesh_p - xf.shape[1])))
        mp = jnp.pad(measurement, ((0, 0), (0, nm_p - measurement.shape[1])))

        def lay(h, wt, b):
            y = jnp.dot(h.astype(jnp.bfloat16), wt,
                        preferred_element_type=jnp.float32)
            return jnp.maximum(y + b, 0.0)

        def enc(h):
            for n in ("enc0", "enc1", "enc2"):
                h = lay(h, *params[n])
            return h

        def dec(h):
            for n in ("dec0", "dec1", "dec2"):
                h = lay(h, *params[n])
            return h

        e, d = enc(xp), dec(mp)
        e2, d2 = enc(d), dec(e)
        nm, mr = measurement.shape[1], xf.shape[1]
        return e[:, :nm], d[:, :mr], e2[:, :nm], d2[:, :mr]

    ref = ref_forward(params, measurement, permittivity)

    # bf16 weights/activations -> loosened tolerance vs the f32-exact check.
    for got, want in zip(outs, ref):
        assert jnp.allclose(got, want, atol=3e-2, rtol=3e-2), (
            float(jnp.max(jnp.abs(got - want))))
    for got, want in zip(outs_layered, ref):
        assert jnp.allclose(got, want, atol=3e-2, rtol=3e-2), (
            float(jnp.max(jnp.abs(got - want))))

    # TODO(synk): the loss() method (weighted MSE) is training-only and not
    # implemented as a kernel.
    print("KERNEL_OK")
</pallas_src>

<mosaic_0001>
module attributes {stable_mosaic.version = 11 : i64} {
  func.func @_fused_forward_kernel(%arg0: memref<2x128xf32, #tpu.memory_space<vmem>>, %arg1: memref<2x128xf32, #tpu.memory_space<vmem>>, %arg2: memref<128x256xbf16, #tpu.memory_space<vmem>>, %arg3: memref<1x256xf32, #tpu.memory_space<vmem>>, %arg4: memref<256x128xbf16, #tpu.memory_space<vmem>>, %arg5: memref<1x128xf32, #tpu.memory_space<vmem>>, %arg6: memref<128x128xbf16, #tpu.memory_space<vmem>>, %arg7: memref<1x128xf32, #tpu.memory_space<vmem>>, %arg8: memref<128x128xbf16, #tpu.memory_space<vmem>>, %arg9: memref<1x128xf32, #tpu.memory_space<vmem>>, %arg10: memref<128x256xbf16, #tpu.memory_space<vmem>>, %arg11: memref<1x256xf32, #tpu.memory_space<vmem>>, %arg12: memref<256x128xbf16, #tpu.memory_space<vmem>>, %arg13: memref<1x128xf32, #tpu.memory_space<vmem>>, %arg14: memref<2x128xf32, #tpu.memory_space<vmem>>, %arg15: memref<2x128xf32, #tpu.memory_space<vmem>>, %arg16: memref<2x128xf32, #tpu.memory_space<vmem>>, %arg17: memref<2x128xf32, #tpu.memory_space<vmem>>) attributes {dimension_semantics = [], scalar_prefetch = 0 : i64, scratch_operands = 0 : i64, tpu.core_type = #tpu.core_type<tc>} {
    %c0 = arith.constant 0 : index
    %c0_0 = arith.constant 0 : index
    %0 = vector.load %arg0[%c0, %c0_0] : memref<2x128xf32, #tpu.memory_space<vmem>>, vector<2x128xf32>
    %c0_1 = arith.constant 0 : index
    %c0_2 = arith.constant 0 : index
    %1 = vector.load %arg1[%c0_1, %c0_2] : memref<2x128xf32, #tpu.memory_space<vmem>>, vector<2x128xf32>
    %2 = arith.truncf %0 : vector<2x128xf32> to vector<2x128xbf16>
    %c0_3 = arith.constant 0 : index
    %c0_4 = arith.constant 0 : index
    %3 = vector.load %arg2[%c0_3, %c0_4] : memref<128x256xbf16, #tpu.memory_space<vmem>>, vector<128x256xbf16>
    %cst = arith.constant dense<0.000000e+00> : vector<2x256xf32>
    %4 = tpu.matmul %2, %3, %cst {dimension_numbers = #tpu.dot_dimension_numbers<[1], [0], [0], [1], [0, 0, 1, 1], [], []>} : vector<2x128xbf16>, vector<128x256xbf16>, vector<2x256xf32> -> vector<2x256xf32>
    %c0_5 = arith.constant 0 : index
    %c0_6 = arith.constant 0 : index
    %5 = vector.load %arg3[%c0_5, %c0_6] : memref<1x256xf32, #tpu.memory_space<vmem>>, vector<1x256xf32>
    %6 = vector.broadcast %5 : vector<1x256xf32> to vector<2x256xf32>
    %7 = arith.addf %4, %6 : vector<2x256xf32>
    %cst_7 = arith.constant 0.000000e+00 : f32
    %8 = vector.broadcast %cst_7 : f32 to vector<2x256xf32>
    %9 = arith.maximumf %7, %8 : vector<2x256xf32>
    %10 = arith.truncf %9 : vector<2x256xf32> to vector<2x256xbf16>
    %c0_8 = arith.constant 0 : index
    %c0_9 = arith.constant 0 : index
    %11 = vector.load %arg4[%c0_8, %c0_9] : memref<256x128xbf16, #tpu.memory_space<vmem>>, vector<256x128xbf16>
    %cst_10 = arith.constant dense<0.000000e+00> : vector<2x128xf32>
    %12 = tpu.matmul %10, %11, %cst_10 {dimension_numbers = #tpu.dot_dimension_numbers<[1], [0], [0], [1], [0, 0, 1, 1], [], []>} : vector<2x256xbf16>, vector<256x128xbf16>, vector<2x128xf32> -> vector<2x128xf32>
    %c0_11 = arith.constant 0 : index
    %c0_12 = arith.constant 0 : index
    %13 = vector.load %arg5[%c0_11, %c0_12] : memref<1x128xf32, #tpu.memory_space<vmem>>, vector<1x128xf32>
    %14 = vector.broadcast %13 : vector<1x128xf32> to vector<2x128xf32>
    %15 = arith.addf %12, %14 : vector<2x128xf32>
    %cst_13 = arith.constant 0.000000e+00 : f32
    %16 = vector.broadcast %cst_13 : f32 to vector<2x128xf32>
    %17 = arith.maximumf %15, %16 : vector<2x128xf32>
    %18 = arith.truncf %17 : vector<2x128xf32> to vector<2x128xbf16>
    %c0_14 = arith.constant 0 : index
    %c0_15 = arith.constant 0 : index
    %19 = vector.load %arg6[%c0_14, %c0_15] : memref<128x128xbf16, #tpu.memory_space<vmem>>, vector<128x128xbf16>
    %cst_16 = arith.constant dense<0.000000e+00> : vector<2x128xf32>
    %20 = tpu.matmul %18, %19, %cst_16 {dimension_numbers = #tpu.dot_dimension_numbers<[1], [0], [0], [1], [0, 0, 1, 1], [], []>} : vector<2x128xbf16>, vector<128x128xbf16>, vector<2x128xf32> -> vector<2x128xf32>
    %c0_17 = arith.constant 0 : index
    %c0_18 = arith.constant 0 : index
    %21 = vector.load %arg7[%c0_17, %c0_18] : memref<1x128xf32, #tpu.memory_space<vmem>>, vector<1x128xf32>
    %22 = vector.broadcast %21 : vector<1x128xf32> to vector<2x128xf32>
    %23 = arith.addf %20, %22 : vector<2x128xf32>
    %cst_19 = arith.constant 0.000000e+00 : f32
    %24 = vector.broadcast %cst_19 : f32 to vector<2x128xf32>
    %25 = arith.maximumf %23, %24 : vector<2x128xf32>
    %26 = arith.truncf %1 : vector<2x128xf32> to vector<2x128xbf16>
    %c0_20 = arith.constant 0 : index
    %c0_21 = arith.constant 0 : index
    %27 = vector.load %arg8[%c0_20, %c0_21] : memref<128x128xbf16, #tpu.memory_space<vmem>>, vector<128x128xbf16>
    %cst_22 = arith.constant dense<0.000000e+00> : vector<2x128xf32>
    %28 = tpu.matmul %26, %27, %cst_22 {dimension_numbers = #tpu.dot_dimension_numbers<[1], [0], [0], [1], [0, 0, 1, 1], [], []>} : vector<2x128xbf16>, vector<128x128xbf16>, vector<2x128xf32> -> vector<2x128xf32>
    %c0_23 = arith.constant 0 : index
    %c0_24 = arith.constant 0 : index
    %29 = vector.load %arg9[%c0_23, %c0_24] : memref<1x128xf32, #tpu.memory_space<vmem>>, vector<1x128xf32>
    %30 = vector.broadcast %29 : vector<1x128xf32> to vector<2x128xf32>
    %31 = arith.addf %28, %30 : vector<2x128xf32>
    %cst_25 = arith.constant 0.000000e+00 : f32
    %32 = vector.broadcast %cst_25 : f32 to vector<2x128xf32>
    %33 = arith.maximumf %31, %32 : vector<2x128xf32>
    %34 = arith.truncf %33 : vector<2x128xf32> to vector<2x128xbf16>
    %c0_26 = arith.constant 0 : index
    %c0_27 = arith.constant 0 : index
    %35 = vector.load %arg10[%c0_26, %c0_27] : memref<128x256xbf16, #tpu.memory_space<vmem>>, vector<128x256xbf16>
    %cst_28 = arith.constant dense<0.000000e+00> : vector<2x256xf32>
    %36 = tpu.matmul %34, %35, %cst_28 {dimension_numbers = #tpu.dot_dimension_numbers<[1], [0], [0], [1], [0, 0, 1, 1], [], []>} : vector<2x128xbf16>, vector<128x256xbf16>, vector<2x256xf32> -> vector<2x256xf32>
    %c0_29 = arith.constant 0 : index
    %c0_30 = arith.constant 0 : index
    %37 = vector.load %arg11[%c0_29, %c0_30] : memref<1x256xf32, #tpu.memory_space<vmem>>, vector<1x256xf32>
    %38 = vector.broadcast %37 : vector<1x256xf32> to vector<2x256xf32>
    %39 = arith.addf %36, %38 : vector<2x256xf32>
    %cst_31 = arith.constant 0.000000e+00 : f32
    %40 = vector.broadcast %cst_31 : f32 to vector<2x256xf32>
    %41 = arith.maximumf %39, %40 : vector<2x256xf32>
    %42 = arith.truncf %41 : vector<2x256xf32> to vector<2x256xbf16>
    %c0_32 = arith.constant 0 : index
    %c0_33 = arith.constant 0 : index
    %43 = vector.load %arg12[%c0_32, %c0_33] : memref<256x128xbf16, #tpu.memory_space<vmem>>, vector<256x128xbf16>
    %cst_34 = arith.constant dense<0.000000e+00> : vector<2x128xf32>
    %44 = tpu.matmul %42, %43, %cst_34 {dimension_numbers = #tpu.dot_dimension_numbers<[1], [0], [0], [1], [0, 0, 1, 1], [], []>} : vector<2x256xbf16>, vector<256x128xbf16>, vector<2x128xf32> -> vector<2x128xf32>
    %c0_35 = arith.constant 0 : index
    %c0_36 = arith.constant 0 : index
    %45 = vector.load %arg13[%c0_35, %c0_36] : memref<1x128xf32, #tpu.memory_space<vmem>>, vector<1x128xf32>
    %46 = vector.broadcast %45 : vector<1x128xf32> to vector<2x128xf32>
    %47 = arith.addf %44, %46 : vector<2x128xf32>
    %cst_37 = arith.constant 0.000000e+00 : f32
    %48 = vector.broadcast %cst_37 : f32 to vector<2x128xf32>
    %49 = arith.maximumf %47, %48 : vector<2x128xf32>
    %c0_38 = arith.constant 0 : index
    %c0_39 = arith.constant 0 : index
    %50 = vector.load %arg14[%c0_38, %c0_39] : memref<2x128xf32, #tpu.memory_space<vmem>>, vector<2x128xf32>
    tpu.vector_store %arg14[%c0_38, %c0_39], %25 {strides = array<i32>} : memref<2x128xf32, #tpu.memory_space<vmem>>, vector<2x128xf32>,
    %c0_40 = arith.constant 0 : index
    %c0_41 = arith.constant 0 : index
    %51 = vector.load %arg15[%c0_40, %c0_41] : memref<2x128xf32, #tpu.memory_space<vmem>>, vector<2x128xf32>
    tpu.vector_store %arg15[%c0_40, %c0_41], %49 {strides = array<i32>} : memref<2x128xf32, #tpu.memory_space<vmem>>, vector<2x128xf32>,
    %52 = arith.truncf %49 : vector<2x128xf32> to vector<2x128xbf16>
    %c0_42 = arith.constant 0 : index
    %c0_43 = arith.constant 0 : index
    %53 = vector.load %arg2[%c0_42, %c0_43] : memref<128x256xbf16, #tpu.memory_space<vmem>>, vector<128x256xbf16>
    %cst_44 = arith.constant dense<0.000000e+00> : vector<2x256xf32>
    %54 = tpu.matmul %52, %53, %cst_44 {dimension_numbers = #tpu.dot_dimension_numbers<[1], [0], [0], [1], [0, 0, 1, 1], [], []>} : vector<2x128xbf16>, vector<128x256xbf16>, vector<2x256xf32> -> vector<2x256xf32>
    %c0_45 = arith.constant 0 : index
    %c0_46 = arith.constant 0 : index
    %55 = vector.load %arg3[%c0_45, %c0_46] : memref<1x256xf32, #tpu.memory_space<vmem>>, vector<1x256xf32>
    %56 = vector.broadcast %55 : vector<1x256xf32> to vector<2x256xf32>
    %57 = arith.addf %54, %56 : vector<2x256xf32>
    %cst_47 = arith.constant 0.000000e+00 : f32
    %58 = vector.broadcast %cst_47 : f32 to vector<2x256xf32>
    %59 = arith.maximumf %57, %58 : vector<2x256xf32>
    %60 = arith.truncf %59 : vector<2x256xf32> to vector<2x256xbf16>
    %c0_48 = arith.constant 0 : index
    %c0_49 = arith.constant 0 : index
    %61 = vector.load %arg4[%c0_48, %c0_49] : memref<256x128xbf16, #tpu.memory_space<vmem>>, vector<256x128xbf16>
    %cst_50 = arith.constant dense<0.000000e+00> : vector<2x128xf32>
    %62 = tpu.matmul %60, %61, %cst_50 {dimension_numbers = #tpu.dot_dimension_numbers<[1], [0], [0], [1], [0, 0, 1, 1], [], []>} : vector<2x256xbf16>, vector<256x128xbf16>, vector<2x128xf32> -> vector<2x128xf32>
    %c0_51 = arith.constant 0 : index
    %c0_52 = arith.constant 0 : index
    %63 = vector.load %arg5[%c0_51, %c0_52] : memref<1x128xf32, #tpu.memory_space<vmem>>, vector<1x128xf32>
    %64 = vector.broadcast %63 : vector<1x128xf32> to vector<2x128xf32>
    %65 = arith.addf %62, %64 : vector<2x128xf32>
    %cst_53 = arith.constant 0.000000e+00 : f32
    %66 = vector.broadcast %cst_53 : f32 to vector<2x128xf32>
    %67 = arith.maximumf %65, %66 : vector<2x128xf32>
    %68 = arith.truncf %67 : vector<2x128xf32> to vector<2x128xbf16>
    %c0_54 = arith.constant 0 : index
    %c0_55 = arith.constant 0 : index
    %69 = vector.load %arg6[%c0_54, %c0_55] : memref<128x128xbf16, #tpu.memory_space<vmem>>, vector<128x128xbf16>
    %cst_56 = arith.constant dense<0.000000e+00> : vector<2x128xf32>
    %70 = tpu.matmul %68, %69, %cst_56 {dimension_numbers = #tpu.dot_dimension_numbers<[1], [0], [0], [1], [0, 0, 1, 1], [], []>} : vector<2x128xbf16>, vector<128x128xbf16>, vector<2x128xf32> -> vector<2x128xf32>
    %c0_57 = arith.constant 0 : index
    %c0_58 = arith.constant 0 : index
    %71 = vector.load %arg7[%c0_57, %c0_58] : memref<1x128xf32, #tpu.memory_space<vmem>>, vector<1x128xf32>
    %72 = vector.broadcast %71 : vector<1x128xf32> to vector<2x128xf32>
    %73 = arith.addf %70, %72 : vector<2x128xf32>
    %cst_59 = arith.constant 0.000000e+00 : f32
    %74 = vector.broadcast %cst_59 : f32 to vector<2x128xf32>
    %75 = arith.maximumf %73, %74 : vector<2x128xf32>
    %c0_60 = arith.constant 0 : index
    %c0_61 = arith.constant 0 : index
    %76 = vector.load %arg16[%c0_60, %c0_61] : memref<2x128xf32, #tpu.memory_space<vmem>>, vector<2x128xf32>
    tpu.vector_store %arg16[%c0_60, %c0_61], %75 {strides = array<i32>} : memref<2x128xf32, #tpu.memory_space<vmem>>, vector<2x128xf32>,
    %77 = arith.truncf %25 : vector<2x128xf32> to vector<2x128xbf16>
    %c0_62 = arith.constant 0 : index
    %c0_63 = arith.constant 0 : index
    %78 = vector.load %arg8[%c0_62, %c0_63] : memref<128x128xbf16, #tpu.memory_space<vmem>>, vector<128x128xbf16>
    %cst_64 = arith.constant dense<0.000000e+00> : vector<2x128xf32>
    %79 = tpu.matmul %77, %78, %cst_64 {dimension_numbers = #tpu.dot_dimension_numbers<[1], [0], [0], [1], [0, 0, 1, 1], [], []>} : vector<2x128xbf16>, vector<128x128xbf16>, vector<2x128xf32> -> vector<2x128xf32>
    %c0_65 = arith.constant 0 : index
    %c0_66 = arith.constant 0 : index
    %80 = vector.load %arg9[%c0_65, %c0_66] : memref<1x128xf32, #tpu.memory_space<vmem>>, vector<1x128xf32>
    %81 = vector.broadcast %80 : vector<1x128xf32> to vector<2x128xf32>
    %82 = arith.addf %79, %81 : vector<2x128xf32>
    %cst_67 = arith.constant 0.000000e+00 : f32
    %83 = vector.broadcast %cst_67 : f32 to vector<2x128xf32>
    %84 = arith.maximumf %82, %83 : vector<2x128xf32>
    %85 = arith.truncf %84 : vector<2x128xf32> to vector<2x128xbf16>
    %c0_68 = arith.constant 0 : index
    %c0_69 = arith.constant 0 : index
    %86 = vector.load %arg10[%c0_68, %c0_69] : memref<128x256xbf16, #tpu.memory_space<vmem>>, vector<128x256xbf16>
    %cst_70 = arith.constant dense<0.000000e+00> : vector<2x256xf32>
    %87 = tpu.matmul %85, %86, %cst_70 {dimension_numbers = #tpu.dot_dimension_numbers<[1], [0], [0], [1], [0, 0, 1, 1], [], []>} : vector<2x128xbf16>, vector<128x256xbf16>, vector<2x256xf32> -> vector<2x256xf32>
    %c0_71 = arith.constant 0 : index
    %c0_72 = arith.constant 0 : index
    %88 = vector.load %arg11[%c0_71, %c0_72] : memref<1x256xf32, #tpu.memory_space<vmem>>, vector<1x256xf32>
    %89 = vector.broadcast %88 : vector<1x256xf32> to vector<2x256xf32>
    %90 = arith.addf %87, %89 : vector<2x256xf32>
    %cst_73 = arith.constant 0.000000e+00 : f32
    %91 = vector.broadcast %cst_73 : f32 to vector<2x256xf32>
    %92 = arith.maximumf %90, %91 : vector<2x256xf32>
    %93 = arith.truncf %92 : vector<2x256xf32> to vector<2x256xbf16>
    %c0_74 = arith.constant 0 : index
    %c0_75 = arith.constant 0 : index
    %94 = vector.load %arg12[%c0_74, %c0_75] : memref<256x128xbf16, #tpu.memory_space<vmem>>, vector<256x128xbf16>
    %cst_76 = arith.constant dense<0.000000e+00> : vector<2x128xf32>
    %95 = tpu.matmul %93, %94, %cst_76 {dimension_numbers = #tpu.dot_dimension_numbers<[1], [0], [0], [1], [0, 0, 1, 1], [], []>} : vector<2x256xbf16>, vector<256x128xbf16>, vector<2x128xf32> -> vector<2x128xf32>
    %c0_77 = arith.constant 0 : index
    %c0_78 = arith.constant 0 : index
    %96 = vector.load %arg13[%c0_77, %c0_78] : memref<1x128xf32, #tpu.memory_space<vmem>>, vector<1x128xf32>
    %97 = vector.broadcast %96 : vector<1x128xf32> to vector<2x128xf32>
    %98 = arith.addf %95, %97 : vector<2x128xf32>
    %cst_79 = arith.constant 0.000000e+00 : f32
    %99 = vector.broadcast %cst_79 : f32 to vector<2x128xf32>
    %100 = arith.maximumf %98, %99 : vector<2x128xf32>
    %c0_80 = arith.constant 0 : index
    %c0_81 = arith.constant 0 : index
    %101 = vector.load %arg17[%c0_80, %c0_81] : memref<2x128xf32, #tpu.memory_space<vmem>>, vector<2x128xf32>
    tpu.vector_store %arg17[%c0_80, %c0_81], %100 {strides = array<i32>} : memref<2x128xf32, #tpu.memory_space<vmem>>, vector<2x128xf32>,
    return
  }
}

</mosaic_0001>

<bundles_post_ra>
// kernel: fnn_autoencoder_forward.1
= control target key start
LH: loop header
LB: loop body
LE: loop exit
PB: predicated region body
PF: predicated region fallthrough
CT: control target
= control target key end

     0   :  { %s3221_s0 = inlined_call_operand.vmem [shape: f32[2,128], index: 0, kind: input, shape index: {}]   ;;  %s3222_s1 = inlined_call_operand.vmem [shape: f32[2,128], index: 1, kind: input, shape index: {}]   ;;  %s3223_s2 = inlined_call_operand.hbm [shape: bf16[128,256], index: 2, kind: input, shape index: {}]   ;;  %s3224_s3 = inlined_call_operand.vmem [shape: f32[1,256], index: 3, kind: input, shape index: {}]   ;;  %s3225_s4 = inlined_call_operand.hbm [shape: bf16[256,128], index: 4, kind: input, shape index: {}]   ;;  %s3226_s5 = inlined_call_operand.vmem [shape: f32[1,128], index: 5, kind: input, shape index: {}]   ;;  %s3227_s6 = inlined_call_operand.hbm [shape: bf16[128,128], index: 6, kind: input, shape index: {}]   ;;  %s3228_s7 = inlined_call_operand.vmem [shape: f32[1,128], index: 7, kind: input, shape index: {}]   ;;  %s3229_s8 = inlined_call_operand.hbm [shape: bf16[128,128], index: 8, kind: input, shape index: {}]   ;;  %s3230_s9 = inlined_call_operand.vmem [shape: f32[1,128], index: 9, kind: input, shape index: {}]   ;;  %s3231_s10 = inlined_call_operand.hbm [shape: bf16[128,256], index: 10, kind: input, shape index: {}]   ;;  %s3232_s11 = inlined_call_operand.vmem [shape: f32[1,256], index: 11, kind: input, shape index: {}]   ;;  %s3233_s12 = inlined_call_operand.hbm [shape: bf16[256,128], index: 12, kind: input, shape index: {}]   ;;  %s3234_s13 = inlined_call_operand.vmem [shape: f32[1,128], index: 13, kind: input, shape index: {}]   ;;  %s3235_s14 = inlined_call_operand.hbm [shape: f32[2,128], index: 14, kind: output, shape index: {0}]   ;;  %s3236_s15 = inlined_call_operand.hbm [shape: f32[2,128], index: 15, kind: output, shape index: {1}]   ;;  %s3237_s16 = inlined_call_operand.hbm [shape: f32[2,128], index: 16, kind: output, shape index: {2}]   ;;  %s3238_s17 = inlined_call_operand.hbm [shape: f32[2,128], index: 17, kind: output, shape index: {3}]  }
   0x1   :  { %3240 = sst [smem:[#allocation26_spill]] %s3221_s0 }
   0x2   :  { %3241 = sst [smem:[#allocation27_spill]] %s3222_s1 }
   0x3   :  { %3242 = sst [smem:[#allocation28_spill]] %s3238_s17 }
   0x4   :  { %23 = vsyncpa [#allocation3], 0 }
   0x5   :  { %24 = vsyncpa [#allocation6], 0 }
   0x6   :  { %25 = vsyncpa [#allocation9], 0 }
   0x7   :  { %26 = vsyncpa [#allocation12], 0 }
   0x8   :  { %27 = vsyncpa [#allocation4], 0 }
   0x9   :  { %28 = vsyncpa [#allocation15], 0 }
   0xa   :  { %29 = vsyncpa [#allocation18], 0  ;;  %s2741_s24 = smov [#allocation5]   ;;  %s2507_s28 = scalar_lea.hbm %s3225_s4, 2048 }
   0xb   :  { %s53_s25 = sshll.u32 %s2741_s24, 4  ;;  %p2508_p0 = scmp.ne.s32.totalorder %s3225_s4, %s2507_s28  ;;  %s54_s25 = int_to_ptr.vmem [resolvable:$true] %s53_s25 }
   0xc   :  { %p2511_p1 = scmp.lt.u32.totalorder %s2507_s28, %s3225_s4 }
   0xe   :  { %p2513_p2 = pnand %p2511_p1, %p2508_p0 }
  0x10   :  { %2516 = shalt.err (!%p2513_p2)
}
  0x11   :  { %s2517_s19 = scalar_lea.vmem %s54_s25, 2048  ;;  %p2522_p4 = scmp.lt.s32.totalorder %s54_s25, %s54_s25 }
  0x12   :  { %p2518_p3 = scmp.ne.s32.totalorder %s54_s25, %s2517_s19  ;;  %p2523_p5 = scmp.lt.s32.totalorder %s2517_s19, %s2517_s19 }
  0x14   :  { %p2524_p6 = por %p2523_p5, %p2522_p4 }
  0x16   :  { %p2525_p7 = pnand %p2524_p6, %p2518_p3 }
  0x18   :  { %2528 = shalt.err (!%p2525_p7)
}
  0x19   :  { %s2742_s1 = smov 64   ;;  %s2743_s20 = smov 4  }
  0x1a   :  { %59 = dma.hbm_to_vmem [thread:$0]  %s3225_s4, 2048, %s54_s25, [#allocation6], %s2742_s1, %s2742_s1, %s2743_s20  }
  0x1b   :  { %s2744_s23 = smov [#allocation8]   ;;  %s2745_s26 = smov [#allocation2]  }
  0x1c   :  { %s81_s24 = sshll.u32 %s2744_s23, 4  ;;  %s39_s27 = sshll.u32 %s2745_s26, 4  ;;  %s82_s24 = int_to_ptr.vmem [resolvable:$true] %s81_s24  ;;  %s40_s27 = int_to_ptr.vmem [resolvable:$true] %s39_s27 }
  0x1d   :  { %s2529_s0 = scalar_lea.hbm %s3229_s8, 1024 }
  0x1e   :  { %p2530_p8 = scmp.ne.s32.totalorder %s3229_s8, %s2529_s0  ;;  %p2533_p9 = scmp.lt.u32.totalorder %s2529_s0, %s3229_s8 }
  0x20   :  { %p2535_p10 = pnand %p2533_p9, %p2530_p8 }
  0x22   :  { %2538 = shalt.err (!%p2535_p10)
}
  0x23   :  { %s2539_s4 = scalar_lea.vmem %s82_s24, 1024  ;;  %p2544_p12 = scmp.lt.s32.totalorder %s82_s24, %s82_s24 }
  0x24   :  { %p2540_p11 = scmp.ne.s32.totalorder %s82_s24, %s2539_s4  ;;  %p2545_p13 = scmp.lt.s32.totalorder %s2539_s4, %s2539_s4 }
  0x26   :  { %p2546_p0 = por %p2545_p13, %p2544_p12 }
  0x28   :  { %p2547_p1 = pnand %p2546_p0, %p2540_p11 }
  0x2a   :  { %2550 = shalt.err (!%p2547_p1)
}
  0x2b   :  { %87 = dma.hbm_to_vmem [thread:$0]  %s3229_s8, 1024, %s82_s24, [#allocation9], %s2742_s1, %s2742_s1, %s2743_s20  }
  0x2c   :  { %s2551_s23 = scalar_lea.hbm %s3223_s2, 2048 }
  0x2d   :  { %p2552_p2 = scmp.ne.s32.totalorder %s3223_s2, %s2551_s23  ;;  %p2555_p3 = scmp.lt.u32.totalorder %s2551_s23, %s3223_s2 }
  0x2f   :  { %p2557_p4 = pnand %p2555_p3, %p2552_p2 }
  0x31   :  { %2560 = shalt.err (!%p2557_p4)
}
  0x32   :  { %s2561_s30 = scalar_lea.vmem %s40_s27, 2048  ;;  %p2566_p6 = scmp.lt.s32.totalorder %s40_s27, %s40_s27 }
  0x33   :  { %p2562_p5 = scmp.ne.s32.totalorder %s40_s27, %s2561_s30  ;;  %p2567_p7 = scmp.lt.s32.totalorder %s2561_s30, %s2561_s30 }
  0x35   :  { %p2568_p8 = por %p2567_p7, %p2566_p6 }
  0x37   :  { %p2569_p9 = pnand %p2568_p8, %p2562_p5 }
  0x39   :  { %2572 = shalt.err (!%p2569_p9)
}
  0x3a   :  { %s2746_s8 = smov 128   ;;  %s2747_s24 = smov 8  }
  0x3b   :  { %45 = dma.hbm_to_vmem [thread:$0]  %s3223_s2, 2048, %s40_s27, [#allocation3], %s2746_s8, %s2746_s8, %s2747_s24  }
  0x3c   :  { %s2748_s4 = smov [#allocation7]   ;;  %s2749_s21 = smov [#allocation10]  }
  0x3d   :  { %s67_s25 = sshll.u32 %s2748_s4, 4  ;;  %s95_s22 = sshll.u32 %s2749_s21, 4  ;;  %s68_s25 = int_to_ptr.vmem [resolvable:$true] %s67_s25  ;;  %s96_s22 = int_to_ptr.vmem [resolvable:$true] %s95_s22 }
  0x3e   :  { %s2573_s26 = scalar_lea.hbm %s3227_s6, 1024 }
  0x3f   :  { %p2574_p10 = scmp.ne.s32.totalorder %s3227_s6, %s2573_s26  ;;  %p2577_p11 = scmp.lt.u32.totalorder %s2573_s26, %s3227_s6 }
  0x41   :  { %p2579_p12 = pnand %p2577_p11, %p2574_p10 }
  0x43   :  { %2582 = shalt.err (!%p2579_p12)
}
  0x44   :  { %s2583_s2 = scalar_lea.vmem %s68_s25, 1024  ;;  %p2588_p0 = scmp.lt.s32.totalorder %s68_s25, %s68_s25 }
  0x45   :  { %p2584_p13 = scmp.ne.s32.totalorder %s68_s25, %s2583_s2  ;;  %p2589_p1 = scmp.lt.s32.totalorder %s2583_s2, %s2583_s2 }
  0x47   :  { %p2590_p2 = por %p2589_p1, %p2588_p0 }
  0x49   :  { %p2591_p3 = pnand %p2590_p2, %p2584_p13 }
  0x4b   :  { %2594 = shalt.err (!%p2591_p3)
}
  0x4c   :  { %73 = dma.hbm_to_vmem [thread:$0]  %s3227_s6, 1024, %s68_s25, [#allocation6], %s2742_s1, %s2742_s1, %s2743_s20  }
  0x4d   :  { %s2595_s21 = scalar_lea.hbm %s3231_s10, 2048 }
  0x4e   :  { %p2596_p4 = scmp.ne.s32.totalorder %s3231_s10, %s2595_s21  ;;  %p2599_p5 = scmp.lt.u32.totalorder %s2595_s21, %s3231_s10 }
  0x50   :  { %p2601_p6 = pnand %p2599_p5, %p2596_p4 }
  0x52   :  { %2604 = shalt.err (!%p2601_p6)
}
  0x53   :  { %s2605_s29 = scalar_lea.vmem %s96_s22, 2048  ;;  %p2610_p8 = scmp.lt.s32.totalorder %s96_s22, %s96_s22 }
  0x54   :  { %p2606_p7 = scmp.ne.s32.totalorder %s96_s22, %s2605_s29  ;;  %p2611_p9 = scmp.lt.s32.totalorder %s2605_s29, %s2605_s29 }
  0x56   :  { %p2612_p10 = por %p2611_p9, %p2610_p8 }
  0x58   :  { %p2613_p11 = pnand %p2612_p10, %p2606_p7 }
  0x5a   :  { %2616 = shalt.err (!%p2613_p11)
}
  0x5b   :  { %101 = dma.hbm_to_vmem [thread:$0]  %s3231_s10, 2048, %s96_s22, [#allocation9], %s2746_s8, %s2746_s8, %s2747_s24  }
  0x5c   :  { %s2750_s0 = smov [#allocation11]   ;;  %s2617_s18 = scalar_lea.hbm %s3233_s12, 2048 }
  0x5d   :  { %s109_s30 = sshll.u32 %s2750_s0, 4  ;;  %p2618_p12 = scmp.ne.s32.totalorder %s3233_s12, %s2617_s18  ;;  %s110_s30 = int_to_ptr.vmem [resolvable:$true] %s109_s30 }
  0x5e   :  { %p2621_p13 = scmp.lt.u32.totalorder %s2617_s18, %s3233_s12 }
  0x60   :  { %p2623_p0 = pnand %p2621_p13, %p2618_p12 }
  0x62   :  { %2626 = shalt.err (!%p2623_p0)
}
  0x63   :  { %s2627_s23 = scalar_lea.vmem %s110_s30, 2048  ;;  %p2632_p2 = scmp.lt.s32.totalorder %s110_s30, %s110_s30 }
  0x64   :  { %p2628_p1 = scmp.ne.s32.totalorder %s110_s30, %s2627_s23  ;;  %p2633_p3 = scmp.lt.s32.totalorder %s2627_s23, %s2627_s23 }
  0x66   :  { %p2634_p4 = por %p2633_p3, %p2632_p2 }
  0x68   :  { %p2635_p5 = pnand %p2634_p4, %p2628_p1 }
  0x6a   :  { %2638 = shalt.err (!%p2635_p5)
}
  0x6b   :  { %115 = dma.hbm_to_vmem [thread:$0]  %s3233_s12, 2048, %s110_s30, [#allocation12], %s2742_s1, %s2742_s1, %s2743_s20  }
  0x6c   :  { %2727 = dma.done.wait [#allocation3], 2048  }
  0x6d   :  { %2728 = vsyncadd [#allocation3], 4294965248 }
  0x6e   :  { %2729 = dma.done.wait [#allocation6], 3072  }
  0x6f   :  { %2730 = vsyncadd [#allocation6], 4294964224 }
  0x70   :  { %2731 = dma.done.wait [#allocation9], 3072  }
  0x71   :  { %2732 = vsyncadd [#allocation9], 4294964224 }
  0x72   :  { %2733 = dma.done.wait [#allocation12], 2048  }
  0x73   :  { %2734 = vsyncadd [#allocation12], 4294965248  ;;  %v2751_v0 = vmov 0   ;;  %v2939_v1 = vld [vmem:[#allocation2 + $0x4] ss:$8 sps:$4 sm:$0xff]   ;;  %v2391_v15 = vld [vmem:[#allocation5 + $0x50] sm:$0xff]   ;;  %v158_v42 = vlaneseq }
  0x74   :  { %280 = vmatprep.mubr.bf16.mxu0 %v2751_v0  ;;  %v2941_v2 = vld [vmem:[#allocation2] ss:$8 sps:$4 sm:$0xff]   ;;  %248 = vmatprep.subr.bf16.mxu0 %v2939_v1  ;;  %v2944_v3 = vld [vmem:[#allocation2 + $0x14] ss:$8 sps:$4 sm:$0xff]   ;;  %v2947_v4 = vld [vmem:[#allocation2 + $0x10] ss:$8 sps:$4 sm:$0xff]  }
  0x75   :  { %249 = vmatpush1.bf16.msra.mxu0 %v2941_v2  ;;  %v2950_v5 = vld [vmem:[#allocation2 + $0x24] ss:$8 sps:$4 sm:$0xff]   ;;  %v2953_v6 = vld [vmem:[#allocation2 + $0x20] ss:$8 sps:$4 sm:$0xff]   ;;  %v2956_v7 = vld [vmem:[#allocation2 + $0x34] ss:$8 sps:$4 sm:$0xff]  }
  0x76   :  { %250 = vmatprep.subr.bf16.mxu0 %v2944_v3  ;;  %v2958_v8 = vld [vmem:[#allocation2 + $0x30] ss:$8 sps:$4 sm:$0xff]   ;;  %v2960_v9 = vld [vmem:[#allocation2 + $0x44] ss:$8 sps:$4 sm:$0xff]   ;;  %v2964_v12 = vld [vmem:[#allocation2 + $0x40] ss:$8 sps:$4 sm:$0xff]  }
  0x77   :  { %v2387_v10 = vld [vmem:[#allocation5 + $0x40] sm:$0xff]   ;;  %v2389_v13 = vld [vmem:[#allocation5 + $0x48] sm:$0xff]   ;;  %v2968_v16 = vld [vmem:[#allocation2 + $0x54] ss:$8 sps:$4 sm:$0xff]   ;;  %s3243_s20 = sld [smem:[#allocation26_spill]]  ;;  %v2752_v35 = vmov 0.0  }
  0x78   :  { %v2388_v11 = vld [vmem:[#allocation5] sm:$0xff]   ;;  %2142 = vmatprep.subr.bf16.mxu1 %v2387_v10  ;;  %v2390_v14 = vld [vmem:[#allocation5 + $0x8] sm:$0xff]   ;;  %v2970_v17 = vld [vmem:[#allocation2 + $0x50] ss:$8 sps:$4 sm:$0xff]   ;;  %vm2753_vm0 = vmmov 0   ;;  %v159_v43 = vshrl.u32 %v158_v42, 7 }
  0x79   :  { %251 = vmatpush1.bf16.msra.mxu0 %v2947_v4  ;;  %2143 = vmatpush3.bf16.msra.mxu1 %v2388_v11  ;;  %v2392_v18 = vld [vmem:[#allocation5 + $0x10] sm:$0xff]   ;;  %v2393_v19 = vld [vmem:[#allocation5 + $0x58] sm:$0xff]   ;;  %v2974_v20 = vld [vmem:[#allocation2 + $0x64] ss:$8 sps:$4 sm:$0xff]   ;;  %s3244_s29 = sld [smem:[#allocation27_spill]]  ;;  %s2754_s21 = smov [#allocation14]  }
  0x7a   :  { %252 = vmatprep.subr.bf16.mxu0 %v2950_v5  ;;  %2144 = vmatprep.subr.bf16.mxu1 %v2389_v13  ;;  %v2976_v21 = vld [vmem:[#allocation2 + $0x60] ss:$8 sps:$4 sm:$0xff]   ;;  %v2978_v22 = vld [vmem:[#allocation2 + $0x74] ss:$8 sps:$4 sm:$0xff]   ;;  %v2982_v26 = vld [vmem:[#allocation2 + $0x70] ss:$8 sps:$4 sm:$0xff]  }
  0x7b   :  { %v2394_v23 = vld [vmem:[#allocation5 + $0x18] sm:$0xff]   ;;  %v2395_v24 = vld [vmem:[#allocation5 + $0x60] sm:$0xff]   ;;  %v2397_v28 = vld [vmem:[#allocation5 + $0x68] sm:$0xff]   ;;  %v3000_v44 = vsub.s32 0, %v159_v43  ;;  %v3005_v46 = vsub.s32 1, %v159_v43  ;;  %s1931_s17 = sshll.u32 %s2754_s21, 4  ;;  %s1932_s17 = int_to_ptr.vmem [resolvable:$true] %s1931_s17 }
  0x7c   :  { %v2396_v25 = vld [vmem:[#allocation5 + $0x20] sm:$0xff]   ;;  %v2398_v29 = vld [vmem:[#allocation5 + $0x28] sm:$0xff]   ;;  %v2399_v31 = vld [vmem:[#allocation5 + $0x70] sm:$0xff]   ;;  %s2639_s10 = scalar_lea.vmem %s1932_s17, 32  ;;  %p2644_p7 = scmp.lt.s32.totalorder %s1932_s17, %s1932_s17 }
  0x7d   :  { %253 = vmatpush1.bf16.msra.mxu0 %v2953_v6  ;;  %2145 = vmatpush3.bf16.msra.mxu1 %v2390_v14  ;;  %v137_v27 = vld [vmem:[%s3243_s20] sm:$0x3]  ;;  %v2400_v32 = vld [vmem:[#allocation5 + $0x30] sm:$0xff]   ;;  %v2401_v33 = vld [vmem:[#allocation5 + $0x78] sm:$0xff]   ;;  %p2640_p6 = scmp.ne.s32.totalorder %s1932_s17, %s2639_s10  ;;  %p2645_p8 = scmp.lt.s32.totalorder %s2639_s10, %s2639_s10 }
  0x7e   :  { %254 = vmatprep.subr.bf16.mxu0 %v2956_v7  ;;  %2146 = vmatprep.subr.bf16.mxu1 %v2391_v15  ;;  %v139_v30 = vpack.c.bf16 %v137_v27, %v137_v27  ;;  %v2402_v34 = vld [vmem:[#allocation5 + $0x38] sm:$0xff]   ;;  %v2411_v36 = vld [vmem:[#allocation7] sm:$0xff]   ;;  %v2412_v37 = vld [vmem:[#allocation7 + $0x8] sm:$0xff]  }
  0x7f   :  { %v2413_v38 = vld [vmem:[#allocation7 + $0x10] sm:$0xff]   ;;  %v2414_v39 = vld [vmem:[#allocation7 + $0x18] sm:$0xff]   ;;  %v2415_v40 = vld [vmem:[#allocation7 + $0x20] sm:$0xff]   ;;  %p2646_p9 = por %p2645_p8, %p2644_p7 }
  0x80   :  { %v2416_v41 = vld [vmem:[#allocation7 + $0x28] sm:$0xff]   ;;  %v156_v45 = vld [vmem:[%s3224_s3] sm:$0x3]  ;;  %v2405_v61 = vld [vmem:[#allocation8 + $0x10] sm:$0xff]  }
  0x81   :  { %255 = vmatpush1.bf16.msra.mxu0 %v2958_v8  ;;  %2147 = vmatpush3.bf16.msra.mxu1 %v2392_v18  ;;  %v161_v47 = vrot.slane %v156_v45, %v3000_v44  ;;  %v165_v48 = vrot.slane %v156_v45, %v3005_v46  ;;  %v2403_v58 = vld [vmem:[#allocation8] sm:$0xff]   ;;  %v2404_v60 = vld [vmem:[#allocation8 + $0x8] sm:$0xff]   ;;  %v2406_v62 = vld [vmem:[#allocation8 + $0x18] sm:$0xff]   ;;  %p2647_p10 = pnand %p2646_p9, %p2640_p6 }
  0x82   :  { %256 = vmatprep.subr.bf16.mxu0 %v2960_v9  ;;  %2148 = vmatprep.subr.bf16.mxu1 %v2393_v19  ;;  %v2407_v63 = vld [vmem:[#allocation8 + $0x20] sm:$0xff]   ;;  %v2408_v10 = vld [vmem:[#allocation8 + $0x28] sm:$0xff]   ;;  %v2409_v11 = vld [vmem:[#allocation8 + $0x30] sm:$0xff]  }
  0x83   :  { %v2410_v13 = vld [vmem:[#allocation8 + $0x38] sm:$0xff]   ;;  %v138_v14 = vld [vmem:[%s3244_s29] sm:$0x3]  ;;  %v2417_v18 = vld [vmem:[#allocation7 + $0x30] sm:$0xff]  }
  0x84   :  { %v582_v15 = vpack.c.bf16 %v138_v14, %v138_v14  ;;  %v2418_v19 = vld [vmem:[#allocation7 + $0x38] sm:$0xff]   ;;  %v3052_v42 = vld [vmem:[#allocation10 + $0x44] ss:$8 sps:$4 sm:$0xff]   ;;  %v3055_v43 = vld [vmem:[#allocation10 + $0x40] ss:$8 sps:$4 sm:$0xff]  }
  0x85   :  { %257 = vmatpush1.bf16.msra.mxu0 %v2964_v12  ;;  %2149 = vmatpush3.bf16.msra.mxu1 %v2394_v23  ;;  %v3022_v23 = vld [vmem:[#allocation10 + $0x4] ss:$8 sps:$4 sm:$0xff]   ;;  %v3058_v45 = vld [vmem:[#allocation10 + $0x54] ss:$8 sps:$4 sm:$0xff]   ;;  %v712_v14 = vld [vmem:[%s3232_s11] sm:$0x3] }
  0x86   :  { %258 = vmatprep.subr.bf16.mxu0 %v2968_v16  ;;  %2150 = vmatprep.subr.bf16.mxu1 %v2395_v24 }
  0x89   :  { %259 = vmatpush1.bf16.msra.mxu0 %v2970_v17  ;;  %2151 = vmatpush3.bf16.msra.mxu1 %v2396_v25  ;;  %v3028_v25 = vld [vmem:[%s3226_s5] ss:$0 sm:$0xff] }
  0x8a   :  { %260 = vmatprep.subr.bf16.mxu0 %v2974_v20  ;;  %2152 = vmatprep.subr.bf16.mxu1 %v2397_v28 }
  0x8d   :  { %261 = vmatpush1.bf16.msra.mxu0 %v2976_v21  ;;  %2153 = vmatpush3.bf16.msra.mxu1 %v2398_v29 }
  0x8e   :  { %262 = vmatprep.subr.bf16.mxu0 %v2978_v22  ;;  %2154 = vmatprep.subr.bf16.mxu1 %v2399_v31 }
  0x91   :  { %263 = vmatpush1.bf16.msra.mxu0 %v2982_v26  ;;  %2155 = vmatpush3.bf16.msra.mxu1 %v2400_v32 }
  0x92   :  { %2156 = vmatprep.subr.bf16.mxu1 %v2401_v33  ;;  %2266 = vmatprep.subr.bf16.mxu0 %v2752_v35  ;;  %v3031_v33 = vld [vmem:[#allocation10] ss:$8 sps:$4 sm:$0xff]  }
  0x94   :  { %281 = vmatmul.mubr.bf16.vlgmr.msra.gmra.mrb[0].mxu0 %v139_v30 }
  0x95   :  { %2157 = vmatpush3.bf16.msra.mxu1 %v2402_v34  ;;  %2282 = vmatprep.mubr.msk.bf16.mxu0 %vm2753_vm0, %v2752_v35 }
  0x96   :  { %2286 = vmatprep.subr.bf16.mxu1 %v2752_v35  ;;  %2267 = vmatpush3.bf16.msra.mxu0 %v2411_v36  ;;  %v3033_v36 = vld [vmem:[#allocation10 + $0x14] ss:$8 sps:$4 sm:$0xff]  }
  0x97   :  { %2268 = vmatprep.subr.bf16.mxu0 %v2752_v35 }
  0x9a   :  { %2269 = vmatpush3.bf16.msra.mxu0 %v2412_v37  ;;  %v3036_v37 = vld [vmem:[#allocation10 + $0x10] ss:$8 sps:$4 sm:$0xff]  }
  0x9b   :  { %2270 = vmatprep.subr.bf16.mxu0 %v2752_v35 }
  0x9e   :  { %2271 = vmatpush3.bf16.msra.mxu0 %v2413_v38  ;;  %v3040_v38 = vld [vmem:[#allocation10 + $0x24] ss:$8 sps:$4 sm:$0xff]  }
  0x9f   :  { %2272 = vmatprep.subr.bf16.mxu0 %v2752_v35 }
  0xa2   :  { %2273 = vmatpush3.bf16.msra.mxu0 %v2414_v39  ;;  %v3043_v39 = vld [vmem:[#allocation10 + $0x20] ss:$8 sps:$4 sm:$0xff]  }
  0xa3   :  { %2274 = vmatprep.subr.bf16.mxu0 %v2752_v35 }
  0xa6   :  { %2275 = vmatpush3.bf16.msra.mxu0 %v2415_v40  ;;  %v3046_v40 = vld [vmem:[#allocation10 + $0x34] ss:$8 sps:$4 sm:$0xff]  }
  0xa7   :  { %2276 = vmatprep.subr.bf16.mxu0 %v2752_v35 }
  0xaa   :  { %2277 = vmatpush3.bf16.msra.mxu0 %v2416_v41  ;;  %v3049_v41 = vld [vmem:[#allocation10 + $0x30] ss:$8 sps:$4 sm:$0xff]  }
  0xab   :  { %2278 = vmatprep.subr.bf16.mxu0 %v2752_v35 }
  0xae   :  { %2279 = vmatpush3.bf16.msra.mxu0 %v2417_v18  ;;  %v721_v18 = vrot.slane %v712_v14, %v3005_v46 }
  0xaf   :  { %2280 = vmatprep.subr.bf16.mxu0 %v2752_v35 }
  0xb2   :  { %2281 = vmatpush3.bf16.msra.mxu0 %v2418_v19 }
  0xb3   :  { %804 = vmatprep.subr.bf16.mxu0 %v3022_v23 }
 0x167   :  { %v282_v49 = vpop.f32.mrb[0].mxu0 }
 0x168   :  { %v283_v50 = vadd.f32 %v282_v49, %v161_v47  ;;  %v284_v51 = vpop.f32.mrb[1].mxu0  ;;  %v3061_v47 = vld [vmem:[#allocation10 + $0x50] ss:$8 sps:$4 sm:$0xff]   ;;  %v3069_v49 = vld [vmem:[%s3230_s9] ss:$0 sm:$0xff] }
 0x169   :  { %v285_v52 = vadd.f32 %v284_v51, %v165_v48  ;;  %v286_v53 = vpop.f32.mrb[2].mxu0  ;;  %v3064_v48 = vld [vmem:[#allocation10 + $0x64] ss:$8 sps:$4 sm:$0xff]  }
 0x16a   :  { %v289_v54 = vmax.f32 %v283_v50, 0.0  ;;  %v287_v55 = vpop.f32.mrb[3].mxu0  ;;  %v3072_v50 = vld [vmem:[#allocation10 + $0x60] ss:$8 sps:$4 sm:$0xff]  }
 0x16b   :  { %v290_v56 = vmax.f32 %v285_v52, 0.0  ;;  %v3075_v52 = vld [vmem:[#allocation10 + $0x74] ss:$8 sps:$4 sm:$0xff]  }
 0x16c   :  { %v291_v59 = vpack.c.bf16 %v289_v54, %v289_v54 }
 0x16d   :  { %v292_v57 = vpack.c.bf16 %v290_v56, %v290_v56 }
 0x16f   :  { %460 = vmatprep.mubr.bf16.mxu1 %v292_v57 }
 0x170   :  { %461 = vmatmul.mubr.bf16.vlgmr.msra.gmra.mrb[0].mxu1 %v291_v59 }
 0x171   :  { %2287 = vmatpush3.bf16.msra.mxu1 %v2403_v58  ;;  %2302 = vmatprep.mubr.msk.bf16.mxu1 %vm2753_vm0, %v2752_v35  ;;  %v3079_v58 = vld [vmem:[#allocation10 + $0x70] ss:$8 sps:$4 sm:$0xff]  }
 0x172   :  { %2288 = vmatprep.subr.bf16.mxu1 %v2752_v35 }
 0x175   :  { %2289 = vmatpush3.bf16.msra.mxu1 %v2404_v60  ;;  %v3104_v60 = vld [vmem:[%s3228_s7] ss:$0 sm:$0xff] }
 0x176   :  { %2290 = vmatprep.subr.bf16.mxu1 %v2752_v35 }
 0x179   :  { %2291 = vmatpush3.bf16.msra.mxu1 %v2405_v61 }
 0x17a   :  { %2292 = vmatprep.subr.bf16.mxu1 %v2752_v35 }
 0x17d   :  { %2293 = vmatpush3.bf16.msra.mxu1 %v2406_v62 }
 0x17e   :  { %2294 = vmatprep.subr.bf16.mxu1 %v2752_v35 }
 0x181   :  { %2295 = vmatpush3.bf16.msra.mxu1 %v2407_v63 }
 0x182   :  { %2296 = vmatprep.subr.bf16.mxu1 %v2752_v35 }
 0x185   :  { %2297 = vmatpush3.bf16.msra.mxu1 %v2408_v10 }
 0x186   :  { %2298 = vmatprep.subr.bf16.mxu1 %v2752_v35 }
 0x189   :  { %2299 = vmatpush3.bf16.msra.mxu1 %v2409_v11 }
 0x18a   :  { %2300 = vmatprep.subr.bf16.mxu1 %v2752_v35 }
 0x18d   :  { %2301 = vmatpush3.bf16.msra.mxu1 %v2410_v13 }
 0x190   :  { %2303 = vmatmul.mubr.bf16.vlgmr.msra.gmra.mrb[4].mxu1 %v582_v15  ;;  %v717_v15 = vrot.slane %v712_v14, %v3000_v44  ;;  %v2485_v14 = vld [vmem:[#allocation7 + $0x10] sm:$0xff]  }
 0x243   :  { %v2158_v24 = vpop.f32.mrb[0].mxu1 }
 0x244   :  { %v2159_v27 = vpop.f32.mrb[1].mxu1 }
 0x245   :  { %v2160_v28 = vadd.f32 %v2159_v27, %v2158_v24  ;;  %v2161_v29 = vpop.f32.mrb[2].mxu1 }
 0x246   :  { %v2162_v30 = vpop.f32.mrb[3].mxu1 }
 0x247   :  { %v463_v31 = vadd.f32 %v2160_v28, %v3028_v25 }
 0x249   :  { %v468_v32 = vmax.f32 %v463_v31, 0.0 }
 0x24b   :  { %v469_v34 = vpack.c.bf16 %v468_v32, %v468_v32 }
 0x24d   :  { %2283 = vmatmul.mubr.bf16.vlgmr.msra.gmra.mrb[4].mxu0 %v469_v34 }
 0x24e   :  { %805 = vmatpush1.bf16.msra.mxu0 %v3031_v33  ;;  %836 = vmatprep.mubr.bf16.mxu0 %v2751_v0 }
 0x24f   :  { %806 = vmatprep.subr.bf16.mxu0 %v3033_v36 }
 0x252   :  { %807 = vmatpush1.bf16.msra.mxu0 %v3036_v37 }
 0x253   :  { %808 = vmatprep.subr.bf16.mxu0 %v3040_v38 }
 0x256   :  { %809 = vmatpush1.bf16.msra.mxu0 %v3043_v39 }
 0x257   :  { %810 = vmatprep.subr.bf16.mxu0 %v3046_v40 }
 0x25a   :  { %811 = vmatpush1.bf16.msra.mxu0 %v3049_v41 }
 0x25b   :  { %812 = vmatprep.subr.bf16.mxu0 %v3052_v42 }
 0x25e   :  { %813 = vmatpush1.bf16.msra.mxu0 %v3055_v43 }
 0x25f   :  { %814 = vmatprep.subr.bf16.mxu0 %v3058_v45 }
 0x262   :  { %815 = vmatpush1.bf16.msra.mxu0 %v3061_v47 }
 0x263   :  { %v688_v51 = vpop.f32.mrb[4].mxu1  ;;  %816 = vmatprep.subr.bf16.mxu0 %v3064_v48 }
 0x264   :  { %v689_v53 = vadd.f32 %v3069_v49, %v688_v51  ;;  %v2304_v54 = vpop.f32.mrb[5].mxu1 }
 0x265   :  { %v691_v55 = vpop.f32.mrb[6].mxu1  ;;  %v2460_v54 = vld [vmem:[#allocation5] sm:$0xff]  }
 0x266   :  { %v694_v56 = vmax.f32 %v689_v53, 0.0  ;;  %v2305_v57 = vpop.f32.mrb[7].mxu1  ;;  %817 = vmatpush1.bf16.msra.mxu0 %v3072_v50  ;;  %v2459_v53 = vld [vmem:[#allocation5 + $0x40] sm:$0xff]   ;;  %v2461_v55 = vld [vmem:[#allocation5 + $0x48] sm:$0xff]  }
 0x267   :  { %818 = vmatprep.subr.bf16.mxu0 %v3075_v52  ;;  %v2463_v57 = vld [vmem:[#allocation5 + $0x50] sm:$0xff]  }
 0x268   :  { %v695_v59 = vpack.c.bf16 %v694_v56, %v694_v56  ;;  %v2462_v56 = vld [vmem:[#allocation5 + $0x8] sm:$0xff]  }
 0x26a   :  { %819 = vmatpush1.bf16.msra.mxu0 %v3079_v58 }
 0x26b   :  { %1136 = vmatprep.subr.bf16.mxu0 %v2939_v1  ;;  %v2443_v1 = vld [vmem:[#allocation11 + $0x40] sm:$0xff]  }
 0x26c   :  { %2182 = vmatprep.subr.bf16.mxu1 %v2443_v1  ;;  %v2465_v1 = vld [vmem:[#allocation5 + $0x58] sm:$0xff]  }
 0x26d   :  { %837 = vmatmul.mubr.bf16.vlgmr.msra.gmra.mrb[8].mxu0 %v695_v59  ;;  %v2464_v59 = vld [vmem:[#allocation5 + $0x10] sm:$0xff]  }
 0x26e   :  { %1137 = vmatpush1.bf16.msra.mxu0 %v2941_v2  ;;  %1168 = vmatprep.mubr.bf16.mxu0 %v2751_v0  ;;  %v2444_v2 = vld [vmem:[#allocation11] sm:$0xff]  }
 0x26f   :  { %1138 = vmatprep.subr.bf16.mxu0 %v2944_v3  ;;  %v2445_v3 = vld [vmem:[#allocation11 + $0x48] sm:$0xff]   ;;  %2183 = vmatpush3.bf16.msra.mxu1 %v2444_v2  ;;  %v2466_v2 = vld [vmem:[#allocation5 + $0x18] sm:$0xff]  }
 0x270   :  { %2184 = vmatprep.subr.bf16.mxu1 %v2445_v3  ;;  %v2467_v3 = vld [vmem:[#allocation5 + $0x60] sm:$0xff]  }
 0x272   :  { %1139 = vmatpush1.bf16.msra.mxu0 %v2947_v4  ;;  %v2446_v4 = vld [vmem:[#allocation11 + $0x8] sm:$0xff]  }
 0x273   :  { %1140 = vmatprep.subr.bf16.mxu0 %v2950_v5  ;;  %v2447_v5 = vld [vmem:[#allocation11 + $0x50] sm:$0xff]   ;;  %2185 = vmatpush3.bf16.msra.mxu1 %v2446_v4  ;;  %v2468_v4 = vld [vmem:[#allocation5 + $0x20] sm:$0xff]  }
 0x274   :  { %2186 = vmatprep.subr.bf16.mxu1 %v2447_v5  ;;  %v2469_v5 = vld [vmem:[#allocation5 + $0x68] sm:$0xff]  }
 0x276   :  { %1141 = vmatpush1.bf16.msra.mxu0 %v2953_v6  ;;  %v2448_v6 = vld [vmem:[#allocation11 + $0x10] sm:$0xff]  }
 0x277   :  { %1142 = vmatprep.subr.bf16.mxu0 %v2956_v7  ;;  %v2449_v7 = vld [vmem:[#allocation11 + $0x58] sm:$0xff]   ;;  %2187 = vmatpush3.bf16.msra.mxu1 %v2448_v6  ;;  %v2470_v6 = vld [vmem:[#allocation5 + $0x28] sm:$0xff]  }
 0x278   :  { %2188 = vmatprep.subr.bf16.mxu1 %v2449_v7 }
 0x27a   :  { %1143 = vmatpush1.bf16.msra.mxu0 %v2958_v8  ;;  %v2450_v8 = vld [vmem:[#allocation11 + $0x18] sm:$0xff]  }
 0x27b   :  { %1144 = vmatprep.subr.bf16.mxu0 %v2960_v9  ;;  %v2451_v9 = vld [vmem:[#allocation11 + $0x60] sm:$0xff]   ;;  %2189 = vmatpush3.bf16.msra.mxu1 %v2450_v8 }
 0x27c   :  { %2190 = vmatprep.subr.bf16.mxu1 %v2451_v9  ;;  %v3118_v8 = vld [vmem:[%s3234_s13] ss:$0 sm:$0xff] }
 0x27e   :  { %1145 = vmatpush1.bf16.msra.mxu0 %v2964_v12  ;;  %v2452_v12 = vld [vmem:[#allocation11 + $0x20] sm:$0xff]  }
 0x27f   :  { %1146 = vmatprep.subr.bf16.mxu0 %v2968_v16  ;;  %v2453_v16 = vld [vmem:[#allocation11 + $0x68] sm:$0xff]   ;;  %2191 = vmatpush3.bf16.msra.mxu1 %v2452_v12 }
 0x280   :  { %2192 = vmatprep.subr.bf16.mxu1 %v2453_v16 }
 0x282   :  { %1147 = vmatpush1.bf16.msra.mxu0 %v2970_v17  ;;  %v2454_v17 = vld [vmem:[#allocation11 + $0x28] sm:$0xff]  }
 0x283   :  { %1148 = vmatprep.subr.bf16.mxu0 %v2974_v20  ;;  %2193 = vmatpush3.bf16.msra.mxu1 %v2454_v17  ;;  %v2455_v20 = vld [vmem:[#allocation11 + $0x70] sm:$0xff]  }
 0x284   :  { %2194 = vmatprep.subr.bf16.mxu1 %v2455_v20 }
 0x286   :  { %1149 = vmatpush1.bf16.msra.mxu0 %v2976_v21  ;;  %v2456_v21 = vld [vmem:[#allocation11 + $0x30] sm:$0xff]  }
 0x287   :  { %1150 = vmatprep.subr.bf16.mxu0 %v2978_v22  ;;  %2195 = vmatpush3.bf16.msra.mxu1 %v2456_v21  ;;  %v2457_v22 = vld [vmem:[#allocation11 + $0x78] sm:$0xff]  }
 0x288   :  { %2196 = vmatprep.subr.bf16.mxu1 %v2457_v22 }
 0x28a   :  { %1151 = vmatpush1.bf16.msra.mxu0 %v2982_v26  ;;  %v2458_v26 = vld [vmem:[#allocation11 + $0x38] sm:$0xff]  }
 0x28b   :  { %2306 = vmatprep.subr.bf16.mxu0 %v2752_v35  ;;  %2197 = vmatpush3.bf16.msra.mxu1 %v2458_v26  ;;  %v2471_v26 = vld [vmem:[#allocation5 + $0x70] sm:$0xff]  }
 0x28c   :  { %2204 = vmatprep.subr.bf16.mxu1 %v2459_v53 }
 0x320   :  { %v575_v61 = vpop.f32.mrb[4].mxu0 }
 0x321   :  { %v576_v62 = vadd.f32 %v3104_v60, %v575_v61  ;;  %v2284_v63 = vpop.f32.mrb[5].mxu0  ;;  %v2472_v61 = vld [vmem:[#allocation5 + $0x30] sm:$0xff]  }
 0x322   :  { %v578_v10 = vpop.f32.mrb[6].mxu0  ;;  %v2474_v63 = vld [vmem:[#allocation5 + $0x38] sm:$0xff]  }
 0x323   :  { %v3107_v11 = vmax.f32 %v576_v62, 0.0  ;;  %v2285_v13 = vpop.f32.mrb[7].mxu0  ;;  %v2473_v62 = vld [vmem:[#allocation5 + $0x78] sm:$0xff]   ;;  %v2483_v10 = vld [vmem:[#allocation7] sm:$0xff]  }
 0x324   :  { %v2484_v13 = vld [vmem:[#allocation7 + $0x8] sm:$0xff]  }
 0x325   :  { %1025 = vst [vmem:[#allocation13] sm:$0x3] %v3107_v11 }
 0x340   :  { %v838_v19 = vpop.f32.mrb[8].mxu0 }
 0x341   :  { %v839_v24 = vadd.f32 %v838_v19, %v717_v15  ;;  %v840_v27 = vpop.f32.mrb[9].mxu0  ;;  %v2486_v15 = vld [vmem:[#allocation7 + $0x18] sm:$0xff]   ;;  %v2488_v19 = vld [vmem:[#allocation7 + $0x28] sm:$0xff]  }
 0x342   :  { %v841_v28 = vadd.f32 %v840_v27, %v721_v18  ;;  %v842_v29 = vpop.f32.mrb[10].mxu0  ;;  %v2487_v18 = vld [vmem:[#allocation7 + $0x20] sm:$0xff]  }
 0x343   :  { %v845_v30 = vmax.f32 %v839_v24, 0.0  ;;  %v843_v31 = vpop.f32.mrb[11].mxu0  ;;  %v1044_v24 = vld [vmem:[%s3224_s3] sm:$0x3] }
 0x344   :  { %v846_v32 = vmax.f32 %v841_v28, 0.0  ;;  %v1049_v27 = vrot.slane %v1044_v24, %v3000_v44  ;;  %v1053_v28 = vrot.slane %v1044_v24, %v3005_v46 }
 0x345   :  { %v847_v51 = vpack.c.bf16 %v845_v30, %v845_v30 }
 0x346   :  { %v848_v34 = vpack.c.bf16 %v846_v32, %v846_v32 }
 0x348   :  { %1016 = vmatprep.mubr.bf16.mxu1 %v848_v34 }
 0x349   :  { %1017 = vmatmul.mubr.bf16.vlgmr.msra.gmra.mrb[8].mxu1 %v847_v51 }
 0x34a   :  { %2205 = vmatpush3.bf16.msra.mxu1 %v2460_v54 }
 0x34b   :  { %2206 = vmatprep.subr.bf16.mxu1 %v2461_v55 }
 0x34e   :  { %2207 = vmatpush3.bf16.msra.mxu1 %v2462_v56  ;;  %v2475_v56 = vld [vmem:[#allocation8] sm:$0xff]  }
 0x34f   :  { %2208 = vmatprep.subr.bf16.mxu1 %v2463_v57 }
 0x352   :  { %2209 = vmatpush3.bf16.msra.mxu1 %v2464_v59  ;;  %v2476_v59 = vld [vmem:[#allocation8 + $0x8] sm:$0xff]  }
 0x353   :  { %2210 = vmatprep.subr.bf16.mxu1 %v2465_v1  ;;  %v2477_v1 = vld [vmem:[#allocation8 + $0x10] sm:$0xff]  }
 0x356   :  { %2211 = vmatpush3.bf16.msra.mxu1 %v2466_v2  ;;  %v2478_v2 = vld [vmem:[#allocation8 + $0x18] sm:$0xff]  }
 0x357   :  { %2212 = vmatprep.subr.bf16.mxu1 %v2467_v3  ;;  %v2479_v3 = vld [vmem:[#allocation8 + $0x20] sm:$0xff]  }
 0x35a   :  { %2213 = vmatpush3.bf16.msra.mxu1 %v2468_v4  ;;  %v2480_v4 = vld [vmem:[#allocation8 + $0x28] sm:$0xff]  }
 0x35b   :  { %2214 = vmatprep.subr.bf16.mxu1 %v2469_v5  ;;  %v2481_v5 = vld [vmem:[#allocation8 + $0x30] sm:$0xff]  }
 0x35e   :  { %2215 = vmatpush3.bf16.msra.mxu1 %v2470_v6  ;;  %v2482_v6 = vld [vmem:[#allocation8 + $0x38] sm:$0xff]  }
 0x35f   :  { %2216 = vmatprep.subr.bf16.mxu1 %v2471_v26 }
 0x362   :  { %2217 = vmatpush3.bf16.msra.mxu1 %v2472_v61 }
 0x363   :  { %2218 = vmatprep.subr.bf16.mxu1 %v2473_v62 }
 0x366   :  { %2219 = vmatpush3.bf16.msra.mxu1 %v2474_v63  ;;  %v2505_v63 = vld [vmem:[#allocation11 + $0x78] sm:$0xff]  }
 0x367   :  { %2326 = vmatprep.subr.bf16.mxu1 %v2752_v35 }
 0x41c   :  { %v2198_v7 = vpop.f32.mrb[8].mxu1 }
 0x41d   :  { %v2199_v9 = vpop.f32.mrb[9].mxu1 }
 0x41e   :  { %v2200_v12 = vadd.f32 %v2199_v9, %v2198_v7  ;;  %v2201_v16 = vpop.f32.mrb[10].mxu1  ;;  %v1471_v7 = vpack.c.bf16 %v3107_v11, %v3107_v11  ;;  %v2489_v9 = vld [vmem:[#allocation7 + $0x30] sm:$0xff]  }
 0x41f   :  { %v2202_v17 = vpop.f32.mrb[11].mxu1  ;;  %v2504_v11 = vld [vmem:[#allocation11 + $0x30] sm:$0xff]  }
 0x420   :  { %v1019_v20 = vadd.f32 %v2200_v12, %v3118_v8  ;;  %v2490_v12 = vld [vmem:[#allocation7 + $0x38] sm:$0xff]  }
 0x422   :  { %v1024_v21 = vmax.f32 %v1019_v20, 0.0 }
 0x424   :  { %v1027_v22 = vpack.c.bf16 %v1024_v21, %v1024_v21  ;;  %1026 = vst [vmem:[#allocation14] sm:$0x3] %v1024_v21 }
 0x426   :  { %1169 = vmatmul.mubr.bf16.vlgmr.msra.gmra.mrb[12].mxu0 %v1027_v22 }
 0x427   :  { %2322 = vmatprep.mubr.msk.bf16.mxu0 %vm2753_vm0, %v2752_v35  ;;  %2307 = vmatpush3.bf16.msra.mxu0 %v2483_v10  ;;  %v2506_v10 = vld [vmem:[#allocation11 + $0x38] sm:$0xff]  }
 0x428   :  { %2308 = vmatprep.subr.bf16.mxu0 %v2752_v35 }
 0x42b   :  { %2309 = vmatpush3.bf16.msra.mxu0 %v2484_v13 }
 0x42c   :  { %2310 = vmatprep.subr.bf16.mxu0 %v2752_v35 }
 0x42f   :  { %2311 = vmatpush3.bf16.msra.mxu0 %v2485_v14 }
 0x430   :  { %2312 = vmatprep.subr.bf16.mxu0 %v2752_v35 }
 0x433   :  { %2313 = vmatpush3.bf16.msra.mxu0 %v2486_v15 }
 0x434   :  { %2314 = vmatprep.subr.bf16.mxu0 %v2752_v35 }
 0x437   :  { %2315 = vmatpush3.bf16.msra.mxu0 %v2487_v18 }
 0x438   :  { %2316 = vmatprep.subr.bf16.mxu0 %v2752_v35 }
 0x43b   :  { %2317 = vmatpush3.bf16.msra.mxu0 %v2488_v19 }
 0x43c   :  { %2318 = vmatprep.subr.bf16.mxu0 %v2752_v35 }
 0x43f   :  { %2319 = vmatpush3.bf16.msra.mxu0 %v2489_v9 }
 0x440   :  { %2320 = vmatprep.subr.bf16.mxu0 %v2752_v35 }
 0x443   :  { %2321 = vmatpush3.bf16.msra.mxu0 %v2490_v12 }
 0x444   :  { %1693 = vmatprep.subr.bf16.mxu0 %v3022_v23 }
 0x4f9   :  { %v1170_v29 = vpop.f32.mrb[12].mxu0 }
 0x4fa   :  { %v1171_v30 = vadd.f32 %v1170_v29, %v1049_v27  ;;  %v1172_v31 = vpop.f32.mrb[13].mxu0  ;;  %v1601_v27 = vld [vmem:[%s3232_s11] sm:$0x3]  ;;  %s2755_s11 = smov [#allocation13]  }
 0x4fb   :  { %v1173_v32 = vadd.f32 %v1172_v31, %v1053_v28  ;;  %v1174_v34 = vpop.f32.mrb[14].mxu0  ;;  %v1606_v28 = vrot.slane %v1601_v27, %v3000_v44  ;;  %v1610_v29 = vrot.slane %v1601_v27, %v3005_v46  ;;  %s1921_s23 = sshll.u32 %s2755_s11, 4  ;;  %s1922_s23 = int_to_ptr.vmem [resolvable:$true] %s1921_s23 }
 0x4fc   :  { %v1177_v51 = vmax.f32 %v1171_v30, 0.0  ;;  %v1175_v53 = vpop.f32.mrb[15].mxu0 }
 0x4fd   :  { %v1178_v54 = vmax.f32 %v1173_v32, 0.0 }
 0x4fe   :  { %v1179_v57 = vpack.c.bf16 %v1177_v51, %v1177_v51 }
 0x4ff   :  { %v1180_v55 = vpack.c.bf16 %v1178_v54, %v1178_v54 }
 0x501   :  { %1348 = vmatprep.mubr.bf16.mxu1 %v1180_v55 }
 0x502   :  { %1349 = vmatmul.mubr.bf16.vlgmr.msra.gmra.mrb[12].mxu1 %v1179_v57 }
 0x503   :  { %2327 = vmatpush3.bf16.msra.mxu1 %v2475_v56  ;;  %2342 = vmatprep.mubr.msk.bf16.mxu1 %vm2753_vm0, %v2752_v35 }
 0x504   :  { %2328 = vmatprep.subr.bf16.mxu1 %v2752_v35 }
 0x507   :  { %2329 = vmatpush3.bf16.msra.mxu1 %v2476_v59 }
 0x508   :  { %2330 = vmatprep.subr.bf16.mxu1 %v2752_v35 }
 0x50b   :  { %2331 = vmatpush3.bf16.msra.mxu1 %v2477_v1 }
 0x50c   :  { %2332 = vmatprep.subr.bf16.mxu1 %v2752_v35 }
 0x50f   :  { %2333 = vmatpush3.bf16.msra.mxu1 %v2478_v2 }
 0x510   :  { %2334 = vmatprep.subr.bf16.mxu1 %v2752_v35 }
 0x513   :  { %2335 = vmatpush3.bf16.msra.mxu1 %v2479_v3 }
 0x514   :  { %2336 = vmatprep.subr.bf16.mxu1 %v2752_v35 }
 0x517   :  { %2337 = vmatpush3.bf16.msra.mxu1 %v2480_v4 }
 0x518   :  { %2338 = vmatprep.subr.bf16.mxu1 %v2752_v35 }
 0x51b   :  { %2339 = vmatpush3.bf16.msra.mxu1 %v2481_v5 }
 0x51c   :  { %2340 = vmatprep.subr.bf16.mxu1 %v2752_v35 }
 0x51f   :  { %2341 = vmatpush3.bf16.msra.mxu1 %v2482_v6 }
 0x522   :  { %2343 = vmatmul.mubr.bf16.vlgmr.msra.gmra.mrb[16].mxu1 %v1471_v7 }
 0x5d5   :  { %v2220_v16 = vpop.f32.mrb[12].mxu1 }
 0x5d6   :  { %v2221_v17 = vpop.f32.mrb[13].mxu1 }
 0x5d7   :  { %v2222_v20 = vadd.f32 %v2221_v17, %v2220_v16  ;;  %v2223_v21 = vpop.f32.mrb[14].mxu1 }
 0x5d8   :  { %v2224_v22 = vpop.f32.mrb[15].mxu1 }
 0x5d9   :  { %v1351_v26 = vadd.f32 %v2222_v20, %v3028_v25 }
 0x5db   :  { %v1356_v61 = vmax.f32 %v1351_v26, 0.0 }
 0x5dd   :  { %v1357_v62 = vpack.c.bf16 %v1356_v61, %v1356_v61 }
 0x5df   :  { %2323 = vmatmul.mubr.bf16.vlgmr.msra.gmra.mrb[16].mxu0 %v1357_v62 }
 0x5e0   :  { %1694 = vmatpush1.bf16.msra.mxu0 %v3031_v33  ;;  %1725 = vmatprep.mubr.bf16.mxu0 %v2751_v0 }
 0x5e1   :  { %1695 = vmatprep.subr.bf16.mxu0 %v3033_v36 }
 0x5e4   :  { %1696 = vmatpush1.bf16.msra.mxu0 %v3036_v37 }
 0x5e5   :  { %1697 = vmatprep.subr.bf16.mxu0 %v3040_v38  ;;  %v2491_v38 = vld [vmem:[#allocation11 + $0x40] sm:$0xff]  }
 0x5e6   :  { %2244 = vmatprep.subr.bf16.mxu1 %v2491_v38 }
 0x5e8   :  { %1698 = vmatpush1.bf16.msra.mxu0 %v3043_v39  ;;  %v2492_v39 = vld [vmem:[#allocation11] sm:$0xff]  }
 0x5e9   :  { %1699 = vmatprep.subr.bf16.mxu0 %v3046_v40  ;;  %v2493_v40 = vld [vmem:[#allocation11 + $0x48] sm:$0xff]   ;;  %2245 = vmatpush3.bf16.msra.mxu1 %v2492_v39 }
 0x5ea   :  { %2246 = vmatprep.subr.bf16.mxu1 %v2493_v40 }
 0x5ec   :  { %1700 = vmatpush1.bf16.msra.mxu0 %v3049_v41  ;;  %v2494_v41 = vld [vmem:[#allocation11 + $0x8] sm:$0xff]  }
 0x5ed   :  { %1701 = vmatprep.subr.bf16.mxu0 %v3052_v42  ;;  %v2495_v42 = vld [vmem:[#allocation11 + $0x50] sm:$0xff]   ;;  %2247 = vmatpush3.bf16.msra.mxu1 %v2494_v41 }
 0x5ee   :  { %2248 = vmatprep.subr.bf16.mxu1 %v2495_v42 }
 0x5f0   :  { %1702 = vmatpush1.bf16.msra.mxu0 %v3055_v43  ;;  %v2496_v43 = vld [vmem:[#allocation11 + $0x10] sm:$0xff]  }
 0x5f1   :  { %1703 = vmatprep.subr.bf16.mxu0 %v3058_v45  ;;  %v2497_v45 = vld [vmem:[#allocation11 + $0x58] sm:$0xff]   ;;  %2249 = vmatpush3.bf16.msra.mxu1 %v2496_v43 }
 0x5f2   :  { %2250 = vmatprep.subr.bf16.mxu1 %v2497_v45 }
 0x5f4   :  { %1704 = vmatpush1.bf16.msra.mxu0 %v3061_v47  ;;  %v2498_v47 = vld [vmem:[#allocation11 + $0x18] sm:$0xff]  }
 0x5f5   :  { %v1577_v0 = vpop.f32.mrb[16].mxu1  ;;  %1705 = vmatprep.subr.bf16.mxu0 %v3064_v48  ;;  %v2499_v48 = vld [vmem:[#allocation11 + $0x60] sm:$0xff]   ;;  %2251 = vmatpush3.bf16.msra.mxu1 %v2498_v47 }
 0x5f6   :  { %v1578_v35 = vadd.f32 %v3069_v49, %v1577_v0  ;;  %v2344_v23 = vpop.f32.mrb[17].mxu1  ;;  %v2500_v49 = vld [vmem:[#allocation11 + $0x20] sm:$0xff]   ;;  %2252 = vmatprep.subr.bf16.mxu1 %v2499_v48 }
 0x5f7   :  { %v1580_v25 = vpop.f32.mrb[18].mxu1 }
 0x5f8   :  { %v2345_v33 = vpop.f32.mrb[19].mxu1  ;;  %1706 = vmatpush1.bf16.msra.mxu0 %v3072_v50  ;;  %v1583_v36 = vmax.f32 %v1578_v35, 0.0  ;;  %v2501_v50 = vld [vmem:[#allocation11 + $0x68] sm:$0xff]  }
 0x5f9   :  { %1707 = vmatprep.subr.bf16.mxu0 %v3075_v52  ;;  %2253 = vmatpush3.bf16.msra.mxu1 %v2500_v49  ;;  %v2502_v52 = vld [vmem:[#allocation11 + $0x28] sm:$0xff]  }
 0x5fa   :  { %v1584_v37 = vpack.c.bf16 %v1583_v36, %v1583_v36  ;;  %2254 = vmatprep.subr.bf16.mxu1 %v2501_v50 }
 0x5fc   :  { %1708 = vmatpush1.bf16.msra.mxu0 %v3079_v58  ;;  %v2503_v58 = vld [vmem:[#allocation11 + $0x70] sm:$0xff]  }
 0x5fd   :  { %2255 = vmatpush3.bf16.msra.mxu1 %v2502_v52 }
 0x5fe   :  { %2256 = vmatprep.subr.bf16.mxu1 %v2503_v58 }
 0x5ff   :  { %1726 = vmatmul.mubr.bf16.vlgmr.msra.gmra.mrb[20].mxu0 %v1584_v37 }
 0x601   :  { %2257 = vmatpush3.bf16.msra.mxu1 %v2504_v11 }
 0x602   :  { %2258 = vmatprep.subr.bf16.mxu1 %v2505_v63 }
 0x605   :  { %2259 = vmatpush3.bf16.msra.mxu1 %v2506_v10 }
 0x6b2   :  { %v1463_v13 = vpop.f32.mrb[16].mxu0 }
 0x6b3   :  { %v1464_v14 = vadd.f32 %v3104_v60, %v1463_v13  ;;  %v2324_v15 = vpop.f32.mrb[17].mxu0 }
 0x6b4   :  { %v1466_v18 = vpop.f32.mrb[18].mxu0 }
 0x6b5   :  { %v1469_v19 = vmax.f32 %v1464_v14, 0.0  ;;  %v2325_v24 = vpop.f32.mrb[19].mxu0 }
 0x6b7   :  { %1470 = vst [vmem:[#allocation16] sm:$0x3] %v1469_v19 }
 0x6d2   :  { %v1727_v30 = vpop.f32.mrb[20].mxu0 }
 0x6d3   :  { %v1728_v31 = vadd.f32 %v1727_v30, %v1606_v28  ;;  %v1729_v32 = vpop.f32.mrb[21].mxu0 }
 0x6d4   :  { %v1730_v34 = vadd.f32 %v1729_v32, %v1610_v29  ;;  %v1731_v51 = vpop.f32.mrb[22].mxu0 }
 0x6d5   :  { %v1734_v53 = vmax.f32 %v1728_v31, 0.0  ;;  %v1732_v60 = vpop.f32.mrb[23].mxu0 }
 0x6d6   :  { %v1735_v54 = vmax.f32 %v1730_v34, 0.0 }
 0x6d7   :  { %v1736_v56 = vpack.c.bf16 %v1734_v53, %v1734_v53 }
 0x6d8   :  { %v1737_v55 = vpack.c.bf16 %v1735_v54, %v1735_v54 }
 0x6da   :  { %1905 = vmatprep.mubr.bf16.mxu1 %v1737_v55 }
 0x6db   :  { %1906 = vmatmul.mubr.bf16.vlgmr.msra.gmra.mrb[20].mxu1 %v1736_v56 }
 0x6dc   :  { %2650 = shalt.err (!%p2647_p10)
}
 0x6dd   :  { %s2651_s1 = scalar_lea.hbm %s3236_s15, 32 }
 0x6de   :  { %p2652_p11 = scmp.ne.s32.totalorder %s3236_s15, %s2651_s1  ;;  %p2655_p12 = scmp.lt.u32.totalorder %s2651_s1, %s3236_s15 }
 0x6e0   :  { %p2657_p13 = pnand %p2655_p12, %p2652_p11 }
 0x6e2   :  { %2660 = shalt.err (!%p2657_p13)
}
 0x6e3   :  { %1934 = dma.vmem_to_hbm [thread:$0]  %s1932_s17, 32, %s3236_s15, [#allocation15]  }
 0x6e4   :  { %s2661_s6 = scalar_lea.vmem %s1922_s23, 32  ;;  %p2666_p1 = scmp.lt.s32.totalorder %s1922_s23, %s1922_s23 }
 0x6e5   :  { %p2662_p0 = scmp.ne.s32.totalorder %s1922_s23, %s2661_s6  ;;  %p2667_p2 = scmp.lt.s32.totalorder %s2661_s6, %s2661_s6 }
 0x6e7   :  { %p2668_p3 = por %p2667_p2, %p2666_p1 }
 0x6e9   :  { %p2669_p4 = pnand %p2668_p3, %p2662_p0 }
 0x6eb   :  { %2672 = shalt.err (!%p2669_p4)
}
 0x6ec   :  { %s2673_s0 = scalar_lea.hbm %s3235_s14, 32 }
 0x6ed   :  { %p2674_p5 = scmp.ne.s32.totalorder %s3235_s14, %s2673_s0  ;;  %p2677_p6 = scmp.lt.u32.totalorder %s2673_s0, %s3235_s14 }
 0x6ef   :  { %p2679_p7 = pnand %p2677_p6, %p2674_p5 }
 0x6f1   :  { %2682 = shalt.err (!%p2679_p7)
}
 0x6f2   :  { %1924 = dma.vmem_to_hbm [thread:$0]  %s1922_s23, 32, %s3235_s14, [#allocation4]  }
 0x6f3   :  { %s2756_s18 = smov [#allocation16]  }
 0x6f4   :  { %s1941_s13 = sshll.u32 %s2756_s18, 4  ;;  %s1942_s13 = int_to_ptr.vmem [resolvable:$true] %s1941_s13 }
 0x6f5   :  { %s2683_s19 = scalar_lea.vmem %s1942_s13, 32  ;;  %p2688_p9 = scmp.lt.s32.totalorder %s1942_s13, %s1942_s13 }
 0x6f6   :  { %p2684_p8 = scmp.ne.s32.totalorder %s1942_s13, %s2683_s19  ;;  %p2689_p10 = scmp.lt.s32.totalorder %s2683_s19, %s2683_s19 }
 0x6f8   :  { %p2690_p11 = por %p2689_p10, %p2688_p9 }
 0x6fa   :  { %p2691_p12 = pnand %p2690_p11, %p2684_p8 }
 0x6fc   :  { %2694 = shalt.err (!%p2691_p12)
}
 0x6fd   :  { %s2695_s21 = scalar_lea.hbm %s3237_s16, 32 }
 0x6fe   :  { %p2696_p13 = scmp.ne.s32.totalorder %s3237_s16, %s2695_s21  ;;  %p2699_p0 = scmp.lt.u32.totalorder %s2695_s21, %s3237_s16 }
 0x700   :  { %p2701_p1 = pnand %p2699_p0, %p2696_p13 }
 0x702   :  { %2704 = shalt.err (!%p2701_p1)
}
 0x703   :  { %1944 = dma.vmem_to_hbm [thread:$0]  %s1942_s13, 32, %s3237_s16, [#allocation15]  }
 0x704   :  { %s2757_s12 = smov [#allocation17]  }
 0x705   :  { %s1951_s1 = sshll.u32 %s2757_s12, 4  ;;  %s1952_s1 = int_to_ptr.vmem [resolvable:$true] %s1951_s1 }
 0x706   :  { %s2705_s20 = scalar_lea.vmem %s1952_s1, 32  ;;  %p2710_p3 = scmp.lt.s32.totalorder %s1952_s1, %s1952_s1 }
 0x707   :  { %p2706_p2 = scmp.ne.s32.totalorder %s1952_s1, %s2705_s20  ;;  %p2711_p4 = scmp.lt.s32.totalorder %s2705_s20, %s2705_s20 }
 0x709   :  { %p2712_p5 = por %p2711_p4, %p2710_p3 }
 0x70b   :  { %p2713_p6 = pnand %p2712_p5, %p2706_p2 }
 0x7ae   :  { %v2260_v44 = vpop.f32.mrb[20].mxu1 }
 0x7af   :  { %v2261_v46 = vpop.f32.mrb[21].mxu1 }
 0x7b0   :  { %v2262_v57 = vadd.f32 %v2261_v46, %v2260_v44  ;;  %v2263_v59 = vpop.f32.mrb[22].mxu1 }
 0x7b1   :  { %v2264_v1 = vpop.f32.mrb[23].mxu1 }
 0x7b2   :  { %v1908_v2 = vadd.f32 %v2262_v57, %v3118_v8 }
 0x7b4   :  { %v1913_v3 = vmax.f32 %v1908_v2, 0.0 }
 0x7b6   :  { %1914 = vst [vmem:[#allocation17] sm:$0x3] %v1913_v3 }
 0x7b7   :  { %2716 = shalt.err (!%p2713_p6)
}
 0x7b8   :  { %s3245_s22 = sld [smem:[#allocation28_spill]] }
 0x7be   :  { %s2717_s26 = scalar_lea.hbm %s3245_s22, 32 }
 0x7bf   :  { %p2718_p7 = scmp.ne.s32.totalorder %s3245_s22, %s2717_s26  ;;  %p2721_p8 = scmp.lt.u32.totalorder %s2717_s26, %s3245_s22 }
 0x7c1   :  { %p2723_p9 = pnand %p2721_p8, %p2718_p7 }
 0x7c3   :  { %2726 = shalt.err (!%p2723_p9)
}
 0x7c4   :  { %1954 = dma.vmem_to_hbm [thread:$0]  %s1952_s1, 32, %s3245_s22, [#allocation18]  }
 0x7c5   :  { %2735 = dma.done.wait [#allocation4], 32  }
 0x7c6   :  { %2736 = vsyncadd [#allocation4], 4294967264 }
 0x7c7   :  { %2737 = dma.done.wait [#allocation15], 64  }
 0x7c8   :  { %2738 = vsyncadd [#allocation15], 4294967232 }
 0x7c9   :  { %2739 = dma.done.wait [#allocation18], 32  }
 0x7ca   :  { %2740 = vsyncadd [#allocation18], 4294967264 }
 0x7cb   :  { %1967 = vsyncpa [#allocation3], 1 }
 0x7cc   :  { %1968 = vsyncpa [#allocation6], 1 }
 0x7cd   :  { %1969 = vsyncpa [#allocation9], 1 }
 0x7ce   :  { %1970 = vsyncpa [#allocation12], 1 }
 0x7cf   :  { %1971 = vsyncpa [#allocation4], 1 }
 0x7d0   :  { %1972 = vsyncpa [#allocation15], 1 }
 0x7d1   :  { %1973 = vsyncpa [#allocation18], 1 }

</bundles_post_ra>
